<compile_context>
chip_gen: v5e
topology: v5e:2x2
jax: 0.10.0
libtpu: 0.0.40
codegen_flags: <defaults>
</compile_context>

<pallas_src>
import functools

import jax
import jax.numpy as jnp
from jax.experimental import pallas as pl
from jax.experimental.pallas import tpu as pltpu

_LANE = 128     # lane width; feature (N) dims padded to multiples of this
_SUBLANE = 8    # sublane width; row tiles are multiples of this
_F32 = 4        # bytes


def _round_up(x, m):
    return (x + m - 1) // m * m


# ----------------------------------------------------------------------------
# Kernel
# ----------------------------------------------------------------------------
def _fused_mlp_kernel(x_ref, *refs, num_layers):
    """Fused MLP body.

    refs = (w0, b0, w1, b1, ..., w_{L-1}, b_{L-1}, o_ref).
    All layers are computed on-chip; only the final activation is stored.
    """
    o_ref = refs[-1]
    h = x_ref[...]                                # (tm, in_dim) f32
    for i in range(num_layers):                   # static unroll (L is small)
        w = refs[2 * i][...]                      # (K_i, N_i), VMEM-resident
        b = refs[2 * i + 1][...]                  # (1, N_i)
        h = jnp.dot(h, w, preferred_element_type=jnp.float32,
                    precision=jax.lax.Precision.HIGHEST) + b
        if i < num_layers - 1:
            h = jnp.maximum(h, 0.0)
    o_ref[...] = h.astype(o_ref.dtype)


# ----------------------------------------------------------------------------
# pallas_call wrapper
# ----------------------------------------------------------------------------
def _fused_mlp_pallas(x2d, padded_params, tm, *, vmem_limit_bytes,
                      single_buffer_weights):
    """x2d: (M, in_dim) f32 (unpadded); padded_params: [(K_i, N_i), (1, N_i)]."""
    M, k0 = x2d.shape
    num_layers = len(padded_params)
    n_out = padded_params[-1][0].shape[1]

    # x tile marches over rows; weights/biases are grid-invariant.
    in_specs = [pl.BlockSpec((tm, k0), lambda i: (i, 0))]
    flat_args = []
    for (w, b) in padded_params:
        k_in, k_out = w.shape
        if single_buffer_weights:
            # Block index never changes -> single VMEM buffer is enough
            # (halves the resident-weight footprint; matters most on v7x).
            in_specs.append(pl.BlockSpec((k_in, k_out), lambda i: (0, 0),
                                         pipeline_mode=pl.Buffered(1)))
            in_specs.append(pl.BlockSpec((1, k_out), lambda i: (0, 0),
                                         pipeline_mode=pl.Buffered(1)))
        else:
            in_specs.append(pl.BlockSpec((k_in, k_out), lambda i: (0, 0)))
            in_specs.append(pl.BlockSpec((1, k_out), lambda i: (0, 0)))
        flat_args += [w, b]

    kernel = functools.partial(_fused_mlp_kernel, num_layers=num_layers)
    return pl.pallas_call(
        kernel,
        out_shape=jax.ShapeDtypeStruct((M, n_out), jnp.float32),
        grid_spec=pltpu.PrefetchScalarGridSpec(
            num_scalar_prefetch=0,
            grid=(pl.cdiv(M, tm),),   # edge blocks: output writes are masked
            in_specs=in_specs,
            out_specs=pl.BlockSpec((tm, n_out), lambda i: (i, 0)),
        ),
        compiler_params=pltpu.CompilerParams(
            # Row tiles are independent -> shardable across v7x's 2 TCs.
            dimension_semantics=("parallel",),
            vmem_limit_bytes=int(vmem_limit_bytes),
        ),
    )(x2d, *flat_args)


# ----------------------------------------------------------------------------
# Budget / tiling heuristics
# ----------------------------------------------------------------------------
def _vmem_budget_bytes():
    """Per-generation scoped-VMEM budget (leave headroom for compiler scratch)."""
    cap = 64 * 1024 * 1024  # conservative default: v7x per-core physical VMEM
    try:
        info = pltpu.get_tpu_info()
        cap = int(getattr(info, "vmem_capacity_bytes", cap))
    except Exception:
        pass
    # ~51 MiB on v7x (64 MiB physical), ~102 MiB on v5e/v6e (128 MiB physical).
    return int(cap * 0.8)


def _vmem_footprint_bytes(tm, k0, padded_params, n_out, weight_bufs):
    """Estimate of the kernel's VMEM usage for a given row tile."""
    w_bytes = sum(int(w.size) + int(b.size) for w, b in padded_params)
    w_bytes *= _F32 * weight_bufs
    x_bytes = 2 * tm * _round_up(k0, _LANE) * _F32     # double-buffered x tile
    o_bytes = 2 * tm * n_out * _F32                    # double-buffered out tile
    widest = max(w.shape[1] for w, _ in padded_params)
    act_bytes = 2 * tm * widest * _F32                 # live h + matmul temp
    return w_bytes + x_bytes + o_bytes + act_bytes


def _select_tm(M, fits, tm_max=1024):
    if M <= 512:
        tm = _round_up(M, _SUBLANE)      # small problem: one tile
    else:
        # Big tiles amortize the ~0.35 us/step pipeline overhead, but keep at
        # least ~4 grid steps so v7x's two TensorCores both get work.
        tm = min(tm_max, max(256, _round_up(pl.cdiv(M, 4), _SUBLANE)))
    while tm > _SUBLANE and not fits(tm):
        tm = _round_up(tm // 2, _SUBLANE)
    return tm


# ----------------------------------------------------------------------------
# Parameters / forward
# ----------------------------------------------------------------------------
def init_mlp_params(key, input_dim, hidden_dim, output_dim, num_layers):
    """Deterministic synthetic params. Weights stored as (in, out); bias (1, out)."""
    h = [hidden_dim] * (num_layers - 1)
    dims_in = [input_dim] + h
    dims_out = h + [output_dim]
    params = []
    for n_in, n_out in zip(dims_in, dims_out):
        key, kw, kb = jax.random.split(key, 3)
        bound = 1.0 / jnp.sqrt(jnp.float32(n_in))  # mimic nn.Linear default init
        w = jax.random.uniform(kw, (n_in, n_out), jnp.float32, -bound, bound)
        b = jax.random.uniform(kb, (1, n_out), jnp.float32, -bound, bound)
        params.append((w, b))
    return params


def pad_mlp_params(params):
    """Zero-pad every layer's output dim to a multiple of 128 (exact).

    Layer 0 keeps its true input dim (x is passed unpadded); later layers'
    input dims are padded to match the previous layer's padded output.  Padded
    weight rows/cols and bias entries are 0 and ReLU(0)=0, so padded activation
    columns stay exactly 0.
    """
    padded = []
    prev_out_pad = None
    for idx, (w, b) in enumerate(params):
        k_in, k_out = w.shape
        k_in_p = k_in if idx == 0 else prev_out_pad
        k_out_p = _round_up(k_out, _LANE)
        w_p = jnp.zeros((k_in_p, k_out_p), jnp.float32).at[:k_in, :k_out].set(w)
        b_p = jnp.zeros((1, k_out_p), jnp.float32).at[:, :k_out].set(b)
        padded.append((w_p, b_p))
        prev_out_pad = k_out_p
    return padded


def mlp_forward(x, params):
    """x: (..., input_dim). Applies Linear->ReLU for all but the last layer."""
    orig_shape = x.shape
    in_dim = orig_shape[-1]
    out_dim = params[-1][0].shape[1]

    x2d = x.reshape(-1, in_dim).astype(jnp.float32)   # no row/feature padding
    M = x2d.shape[0]

    padded_params = pad_mlp_params(params)
    n_out_pad = padded_params[-1][0].shape[1]

    budget = _vmem_budget_bytes()
    headroom = 8 * 1024 * 1024

    def fits(tm):
        return (_vmem_footprint_bytes(tm, in_dim, padded_params, n_out_pad,
                                      weight_bufs=1) + headroom) <= budget

    tm = _select_tm(M, fits)

    try:
        out_pad = _fused_mlp_pallas(
            x2d, padded_params, tm,
            vmem_limit_bytes=budget, single_buffer_weights=True)
        out_pad = jax.block_until_ready(out_pad)
    except Exception:
        # Fallback for jax versions where pipeline_mode=pl.Buffered(1) is not
        # supported on TPU pallas_call: default double-buffered weights.
        out_pad = _fused_mlp_pallas(
            x2d, padded_params, tm,
            vmem_limit_bytes=budget, single_buffer_weights=False)
        out_pad = jax.block_until_ready(out_pad)

    out = out_pad[:, :out_dim]          # drop lane padding on the output dim
    return out.reshape(orig_shape[:-1] + (out_dim,))


# ----------------------------------------------------------------------------
# Reference + self-check
# ----------------------------------------------------------------------------
def _reference_forward(x, params):
    x2d = x.reshape(-1, x.shape[-1]).astype(jnp.float32)
    n = len(params)
    for i, (w, b) in enumerate(params):
        x2d = jnp.dot(x2d, w, precision=jax.lax.Precision.HIGHEST) + b
        if i < n - 1:
            x2d = jnp.maximum(x2d, 0.0)
    return x2d.reshape(x.shape[:-1] + (params[-1][0].shape[1],))


if __name__ == "__main__":
    key = jax.random.PRNGKey(0)
    k_x, k_p = jax.random.split(key)

    batch, seq = 2, 8
    input_dim, hidden_dim, output_dim, num_layers = 32, 64, 16, 3

    x = jax.random.normal(k_x, (batch, seq, input_dim), jnp.float32)
    params = init_mlp_params(k_p, input_dim, hidden_dim, output_dim, num_layers)

    out = mlp_forward(x, params)
    out = jax.block_until_ready(out)

    ref = _reference_forward(x, params)
    assert out.shape == (batch, seq, output_dim), out.shape
    assert jnp.allclose(out, ref, atol=1e-5, rtol=1e-5), "mismatch vs reference"

    print("KERNEL_OK")
</pallas_src>

<mosaic_0001>
module attributes {stable_mosaic.version = 11 : i64} {
  func.func @_fused_mlp_kernel(%arg0: i32, %arg1: memref<16x32xf32, #tpu.memory_space<vmem>>, %arg2: memref<32x128xf32, #tpu.memory_space<vmem>>, %arg3: memref<1x128xf32, #tpu.memory_space<vmem>>, %arg4: memref<128x128xf32, #tpu.memory_space<vmem>>, %arg5: memref<1x128xf32, #tpu.memory_space<vmem>>, %arg6: memref<128x128xf32, #tpu.memory_space<vmem>>, %arg7: memref<1x128xf32, #tpu.memory_space<vmem>>, %arg8: memref<16x128xf32, #tpu.memory_space<vmem>>) attributes {dimension_semantics = [#tpu.dimension_semantics<parallel>], iteration_bounds = array<i64: 1>, scalar_prefetch = 0 : i64, scratch_operands = 0 : i64, tpu.core_type = #tpu.core_type<tc>, window_params = [{transform_indices = @transform_0, window_bounds = array<i64: 16, 32>}, {pipeline_mode = #tpu.pipeline_mode<synchronous>, transform_indices = @transform_1, window_bounds = array<i64: 32, 128>}, {pipeline_mode = #tpu.pipeline_mode<synchronous>, transform_indices = @transform_2, window_bounds = array<i64: 1, 128>}, {pipeline_mode = #tpu.pipeline_mode<synchronous>, transform_indices = @transform_3, window_bounds = array<i64: 128, 128>}, {pipeline_mode = #tpu.pipeline_mode<synchronous>, transform_indices = @transform_4, window_bounds = array<i64: 1, 128>}, {pipeline_mode = #tpu.pipeline_mode<synchronous>, transform_indices = @transform_5, window_bounds = array<i64: 128, 128>}, {pipeline_mode = #tpu.pipeline_mode<synchronous>, transform_indices = @transform_6, window_bounds = array<i64: 1, 128>}, {transform_indices = @transform_7, window_bounds = array<i64: 16, 128>}]} {
    %c0 = arith.constant 0 : index
    %c0_0 = arith.constant 0 : index
    %0 = vector.load %arg1[%c0, %c0_0] : memref<16x32xf32, #tpu.memory_space<vmem>>, vector<16x32xf32>
    %c0_1 = arith.constant 0 : index
    %c0_2 = arith.constant 0 : index
    %1 = vector.load %arg2[%c0_1, %c0_2] : memref<32x128xf32, #tpu.memory_space<vmem>>, vector<32x128xf32>
    %c0_3 = arith.constant 0 : index
    %c0_4 = arith.constant 0 : index
    %2 = vector.load %arg3[%c0_3, %c0_4] : memref<1x128xf32, #tpu.memory_space<vmem>>, vector<1x128xf32>
    %cst = arith.constant dense<0.000000e+00> : vector<16x128xf32>
    %3 = tpu.matmul %0, %1, %cst {dimension_numbers = #tpu.dot_dimension_numbers<[1], [0], [0], [1], [0, 0, 1, 1], [], []>, precision = #tpu.contract_precision<fp32>} : vector<16x32xf32>, vector<32x128xf32>, vector<16x128xf32> -> vector<16x128xf32>
    %4 = vector.broadcast %2 : vector<1x128xf32> to vector<16x128xf32>
    %5 = arith.addf %3, %4 : vector<16x128xf32>
    %cst_5 = arith.constant 0.000000e+00 : f32
    %6 = vector.broadcast %cst_5 : f32 to vector<16x128xf32>
    %7 = arith.maximumf %5, %6 : vector<16x128xf32>
    %c0_6 = arith.constant 0 : index
    %c0_7 = arith.constant 0 : index
    %8 = vector.load %arg4[%c0_6, %c0_7] : memref<128x128xf32, #tpu.memory_space<vmem>>, vector<128x128xf32>
    %c0_8 = arith.constant 0 : index
    %c0_9 = arith.constant 0 : index
    %9 = vector.load %arg5[%c0_8, %c0_9] : memref<1x128xf32, #tpu.memory_space<vmem>>, vector<1x128xf32>
    %cst_10 = arith.constant dense<0.000000e+00> : vector<16x128xf32>
    %10 = tpu.matmul %7, %8, %cst_10 {dimension_numbers = #tpu.dot_dimension_numbers<[1], [0], [0], [1], [0, 0, 1, 1], [], []>, precision = #tpu.contract_precision<fp32>} : vector<16x128xf32>, vector<128x128xf32>, vector<16x128xf32> -> vector<16x128xf32>
    %11 = vector.broadcast %9 : vector<1x128xf32> to vector<16x128xf32>
    %12 = arith.addf %10, %11 : vector<16x128xf32>
    %cst_11 = arith.constant 0.000000e+00 : f32
    %13 = vector.broadcast %cst_11 : f32 to vector<16x128xf32>
    %14 = arith.maximumf %12, %13 : vector<16x128xf32>
    %c0_12 = arith.constant 0 : index
    %c0_13 = arith.constant 0 : index
    %15 = vector.load %arg6[%c0_12, %c0_13] : memref<128x128xf32, #tpu.memory_space<vmem>>, vector<128x128xf32>
    %c0_14 = arith.constant 0 : index
    %c0_15 = arith.constant 0 : index
    %16 = vector.load %arg7[%c0_14, %c0_15] : memref<1x128xf32, #tpu.memory_space<vmem>>, vector<1x128xf32>
    %cst_16 = arith.constant dense<0.000000e+00> : vector<16x128xf32>
    %17 = tpu.matmul %14, %15, %cst_16 {dimension_numbers = #tpu.dot_dimension_numbers<[1], [0], [0], [1], [0, 0, 1, 1], [], []>, precision = #tpu.contract_precision<fp32>} : vector<16x128xf32>, vector<128x128xf32>, vector<16x128xf32> -> vector<16x128xf32>
    %18 = vector.broadcast %16 : vector<1x128xf32> to vector<16x128xf32>
    %19 = arith.addf %17, %18 : vector<16x128xf32>
    %c0_17 = arith.constant 0 : index
    %c0_18 = arith.constant 0 : index
    %20 = vector.load %arg8[%c0_17, %c0_18] : memref<16x128xf32, #tpu.memory_space<vmem>>, vector<16x128xf32>
    tpu.vector_store %arg8[%c0_17, %c0_18], %19 {strides = array<i32>} : memref<16x128xf32, #tpu.memory_space<vmem>>, vector<16x128xf32>,
    return
  }
  func.func @transform_0(%arg0: i32) -> (i32, i32) {
    %c0_i32 = arith.constant 0 : i32
    %c0_i32_0 = arith.constant 0 : i32
    return %arg0, %c0_i32 : i32, i32
  }
  func.func @transform_1(%arg0: i32) -> (i32, i32) {
    %c0_i32 = arith.constant 0 : i32
    %c0_i32_0 = arith.constant 0 : i32
    %c0_i32_1 = arith.constant 0 : i32
    return %c0_i32, %c0_i32_0 : i32, i32
  }
  func.func @transform_2(%arg0: i32) -> (i32, i32) {
    %c0_i32 = arith.constant 0 : i32
    %c0_i32_0 = arith.constant 0 : i32
    %c0_i32_1 = arith.constant 0 : i32
    return %c0_i32, %c0_i32_0 : i32, i32
  }
  func.func @transform_3(%arg0: i32) -> (i32, i32) {
    %c0_i32 = arith.constant 0 : i32
    %c0_i32_0 = arith.constant 0 : i32
    %c0_i32_1 = arith.constant 0 : i32
    return %c0_i32, %c0_i32_0 : i32, i32
  }
  func.func @transform_4(%arg0: i32) -> (i32, i32) {
    %c0_i32 = arith.constant 0 : i32
    %c0_i32_0 = arith.constant 0 : i32
    %c0_i32_1 = arith.constant 0 : i32
    return %c0_i32, %c0_i32_0 : i32, i32
  }
  func.func @transform_5(%arg0: i32) -> (i32, i32) {
    %c0_i32 = arith.constant 0 : i32
    %c0_i32_0 = arith.constant 0 : i32
    %c0_i32_1 = arith.constant 0 : i32
    return %c0_i32, %c0_i32_0 : i32, i32
  }
  func.func @transform_6(%arg0: i32) -> (i32, i32) {
    %c0_i32 = arith.constant 0 : i32
    %c0_i32_0 = arith.constant 0 : i32
    %c0_i32_1 = arith.constant 0 : i32
    return %c0_i32, %c0_i32_0 : i32, i32
  }
  func.func @transform_7(%arg0: i32) -> (i32, i32) {
    %c0_i32 = arith.constant 0 : i32
    %c0_i32_0 = arith.constant 0 : i32
    return %arg0, %c0_i32 : i32, i32
  }
}

module attributes {stable_mosaic.version = 11 : i64} {
  func.func @_fused_mlp_kernel(%arg0: i32, %arg1: memref<16x32xf32, #tpu.memory_space<vmem>>, %arg2: memref<32x128xf32, #tpu.memory_space<vmem>>, %arg3: memref<1x128xf32, #tpu.memory_space<vmem>>, %arg4: memref<128x128xf32, #tpu.memory_space<vmem>>, %arg5: memref<1x128xf32, #tpu.memory_space<vmem>>, %arg6: memref<128x128xf32, #tpu.memory_space<vmem>>, %arg7: memref<1x128xf32, #tpu.memory_space<vmem>>, %arg8: memref<16x128xf32, #tpu.memory_space<vmem>>) attributes {dimension_semantics = [#tpu.dimension_semantics<parallel>], iteration_bounds = array<i64: 1>, scalar_prefetch = 0 : i64, scratch_operands = 0 : i64, tpu.core_type = #tpu.core_type<tc>, window_params = [{transform_indices = @transform_0, window_bounds = array<i64: 16, 32>}, {pipeline_mode = #tpu.pipeline_mode<synchronous>, transform_indices = @transform_1, window_bounds = array<i64: 32, 128>}, {pipeline_mode = #tpu.pipeline_mode<synchronous>, transform_indices = @transform_2, window_bounds = array<i64: 1, 128>}, {pipeline_mode = #tpu.pipeline_mode<synchronous>, transform_indices = @transform_3, window_bounds = array<i64: 128, 128>}, {pipeline_mode = #tpu.pipeline_mode<synchronous>, transform_indices = @transform_4, window_bounds = array<i64: 1, 128>}, {pipeline_mode = #tpu.pipeline_mode<synchronous>, transform_indices = @transform_5, window_bounds = array<i64: 128, 128>}, {pipeline_mode = #tpu.pipeline_mode<synchronous>, transform_indices = @transform_6, window_bounds = array<i64: 1, 128>}, {transform_indices = @transform_7, window_bounds = array<i64: 16, 128>}]} {
    %c0 = arith.constant 0 : index
    %c0_0 = arith.constant 0 : index
    %0 = vector.load %arg1[%c0, %c0_0] : memref<16x32xf32, #tpu.memory_space<vmem>>, vector<16x32xf32>
    %c0_1 = arith.constant 0 : index
    %c0_2 = arith.constant 0 : index
    %1 = vector.load %arg2[%c0_1, %c0_2] : memref<32x128xf32, #tpu.memory_space<vmem>>, vector<32x128xf32>
    %c0_3 = arith.constant 0 : index
    %c0_4 = arith.constant 0 : index
    %2 = vector.load %arg3[%c0_3, %c0_4] : memref<1x128xf32, #tpu.memory_space<vmem>>, vector<1x128xf32>
    %cst = arith.constant dense<0.000000e+00> : vector<16x128xf32>
    %3 = tpu.matmul %0, %1, %cst {dimension_numbers = #tpu.dot_dimension_numbers<[1], [0], [0], [1], [0, 0, 1, 1], [], []>, precision = #tpu.contract_precision<fp32>} : vector<16x32xf32>, vector<32x128xf32>, vector<16x128xf32> -> vector<16x128xf32>
    %4 = vector.broadcast %2 : vector<1x128xf32> to vector<16x128xf32>
    %5 = arith.addf %3, %4 : vector<16x128xf32>
    %cst_5 = arith.constant 0.000000e+00 : f32
    %6 = vector.broadcast %cst_5 : f32 to vector<16x128xf32>
    %7 = arith.maximumf %5, %6 : vector<16x128xf32>
    %c0_6 = arith.constant 0 : index
    %c0_7 = arith.constant 0 : index
    %8 = vector.load %arg4[%c0_6, %c0_7] : memref<128x128xf32, #tpu.memory_space<vmem>>, vector<128x128xf32>
    %c0_8 = arith.constant 0 : index
    %c0_9 = arith.constant 0 : index
    %9 = vector.load %arg5[%c0_8, %c0_9] : memref<1x128xf32, #tpu.memory_space<vmem>>, vector<1x128xf32>
    %cst_10 = arith.constant dense<0.000000e+00> : vector<16x128xf32>
    %10 = tpu.matmul %7, %8, %cst_10 {dimension_numbers = #tpu.dot_dimension_numbers<[1], [0], [0], [1], [0, 0, 1, 1], [], []>, precision = #tpu.contract_precision<fp32>} : vector<16x128xf32>, vector<128x128xf32>, vector<16x128xf32> -> vector<16x128xf32>
    %11 = vector.broadcast %9 : vector<1x128xf32> to vector<16x128xf32>
    %12 = arith.addf %10, %11 : vector<16x128xf32>
    %cst_11 = arith.constant 0.000000e+00 : f32
    %13 = vector.broadcast %cst_11 : f32 to vector<16x128xf32>
    %14 = arith.maximumf %12, %13 : vector<16x128xf32>
    %c0_12 = arith.constant 0 : index
    %c0_13 = arith.constant 0 : index
    %15 = vector.load %arg6[%c0_12, %c0_13] : memref<128x128xf32, #tpu.memory_space<vmem>>, vector<128x128xf32>
    %c0_14 = arith.constant 0 : index
    %c0_15 = arith.constant 0 : index
    %16 = vector.load %arg7[%c0_14, %c0_15] : memref<1x128xf32, #tpu.memory_space<vmem>>, vector<1x128xf32>
    %cst_16 = arith.constant dense<0.000000e+00> : vector<16x128xf32>
    %17 = tpu.matmul %14, %15, %cst_16 {dimension_numbers = #tpu.dot_dimension_numbers<[1], [0], [0], [1], [0, 0, 1, 1], [], []>, precision = #tpu.contract_precision<fp32>} : vector<16x128xf32>, vector<128x128xf32>, vector<16x128xf32> -> vector<16x128xf32>
    %18 = vector.broadcast %16 : vector<1x128xf32> to vector<16x128xf32>
    %19 = arith.addf %17, %18 : vector<16x128xf32>
    %c0_17 = arith.constant 0 : index
    %c0_18 = arith.constant 0 : index
    %20 = vector.load %arg8[%c0_17, %c0_18] : memref<16x128xf32, #tpu.memory_space<vmem>>, vector<16x128xf32>
    tpu.vector_store %arg8[%c0_17, %c0_18], %19 {strides = array<i32>} : memref<16x128xf32, #tpu.memory_space<vmem>>, vector<16x128xf32>,
    return
  }
  func.func @transform_0(%arg0: i32) -> (i32, i32) {
    %c0_i32 = arith.constant 0 : i32
    %c0_i32_0 = arith.constant 0 : i32
    return %arg0, %c0_i32 : i32, i32
  }
  func.func @transform_1(%arg0: i32) -> (i32, i32) {
    %c0_i32 = arith.constant 0 : i32
    %c0_i32_0 = arith.constant 0 : i32
    %c0_i32_1 = arith.constant 0 : i32
    return %c0_i32, %c0_i32_0 : i32, i32
  }
  func.func @transform_2(%arg0: i32) -> (i32, i32) {
    %c0_i32 = arith.constant 0 : i32
    %c0_i32_0 = arith.constant 0 : i32
    %c0_i32_1 = arith.constant 0 : i32
    return %c0_i32, %c0_i32_0 : i32, i32
  }
  func.func @transform_3(%arg0: i32) -> (i32, i32) {
    %c0_i32 = arith.constant 0 : i32
    %c0_i32_0 = arith.constant 0 : i32
    %c0_i32_1 = arith.constant 0 : i32
    return %c0_i32, %c0_i32_0 : i32, i32
  }
  func.func @transform_4(%arg0: i32) -> (i32, i32) {
    %c0_i32 = arith.constant 0 : i32
    %c0_i32_0 = arith.constant 0 : i32
    %c0_i32_1 = arith.constant 0 : i32
    return %c0_i32, %c0_i32_0 : i32, i32
  }
  func.func @transform_5(%arg0: i32) -> (i32, i32) {
    %c0_i32 = arith.constant 0 : i32
    %c0_i32_0 = arith.constant 0 : i32
    %c0_i32_1 = arith.constant 0 : i32
    return %c0_i32, %c0_i32_0 : i32, i32
  }
  func.func @transform_6(%arg0: i32) -> (i32, i32) {
    %c0_i32 = arith.constant 0 : i32
    %c0_i32_0 = arith.constant 0 : i32
    %c0_i32_1 = arith.constant 0 : i32
    return %c0_i32, %c0_i32_0 : i32, i32
  }
  func.func @transform_7(%arg0: i32) -> (i32, i32) {
    %c0_i32 = arith.constant 0 : i32
    %c0_i32_0 = arith.constant 0 : i32
    return %arg0, %c0_i32 : i32, i32
  }
}

</mosaic_0001>

<bundles_post_ra>
// kernel: tpu_custom_call.1
= control target key start
LH: loop header
LB: loop body
LE: loop exit
PB: predicated region body
PF: predicated region fallthrough
CT: control target
= control target key end

     0   :  { %12 = vsyncpa [#allocation3], 0  ;;  %s1842_s0 = inlined_call_operand.hbm [shape: f32[16,32], index: 0, kind: input, shape index: {}]   ;;  %s1843_s1 = inlined_call_operand.hbm [shape: f32[32,128], index: 1, kind: input, shape index: {}]   ;;  %s1844_s2 = inlined_call_operand.vmem [shape: f32[1,128], index: 2, kind: input, shape index: {}]   ;;  %s1845_s3 = inlined_call_operand.hbm [shape: f32[128,128], index: 3, kind: input, shape index: {}]   ;;  %s1846_s4 = inlined_call_operand.vmem [shape: f32[1,128], index: 4, kind: input, shape index: {}]   ;;  %s1847_s5 = inlined_call_operand.hbm [shape: f32[128,128], index: 5, kind: input, shape index: {}]   ;;  %s1848_s6 = inlined_call_operand.vmem [shape: f32[1,128], index: 6, kind: input, shape index: {}]   ;;  %s1849_s7 = inlined_call_operand.hbm [shape: f32[16,128], index: 7, kind: output, shape index: {}]  }
   0x1   :  { %13 = vsyncpa [#allocation6], 0 }
   0x2   :  { %14 = vsyncpa [#allocation9], 0 }
   0x3   :  { %15 = vsyncpa [#allocation4], 0  ;;  %s33_s26 = sshll.u32 %s1843_s1, 4  ;;  %s1280_s27 = smov [#allocation5]   ;;  %s34_s26 = int_to_ptr.hbm [resolvable:$true] %s33_s26 }
   0x4   :  { %s35_s28 = sshll.u32 %s1280_s27, 4  ;;  %s20_s8 = sshll.u32 %s1842_s0, 4  ;;  %s36_s28 = int_to_ptr.vmem [resolvable:$true] %s35_s28  ;;  %s21_s8 = int_to_ptr.hbm [resolvable:$true] %s20_s8 }
   0x5   :  { %s1281_s9 = smov 128   ;;  %s1282_s10 = smov 8  }
   0x6   :  { %41 = dma.hbm_to_vmem [thread:$0]  %s34_s26, 512, %s36_s28, [#allocation6], %s1281_s9, %s1281_s9, %s1282_s10  }
   0x7   :  { %s1283_s11 = smov [#allocation2]   ;;  %s48_s1 = sshll.u32 %s1845_s3, 4  ;;  %s49_s1 = int_to_ptr.hbm [resolvable:$true] %s48_s1 }
   0x8   :  { %s22_s12 = sshll.u32 %s1283_s11, 4  ;;  %s63_s16 = sshll.u32 %s1847_s5, 4  ;;  %s23_s12 = int_to_ptr.vmem [resolvable:$true] %s22_s12  ;;  %s64_s16 = int_to_ptr.hbm [resolvable:$true] %s63_s16 }
   0x9   :  { %28 = dma.hbm_to_vmem [thread:$0]  %s21_s8, 256, %s23_s12, [#allocation3], %s1281_s9, %s1281_s9, %s1282_s10  }
   0xa   :  { %s1284_s17 = smov [#allocation7]   ;;  %s1285_s19 = smov [#allocation8]  }
   0xb   :  { %s50_s18 = sshll.u32 %s1284_s17, 4  ;;  %s65_s3 = sshll.u32 %s1285_s19, 4  ;;  %s51_s18 = int_to_ptr.vmem [resolvable:$true] %s50_s18  ;;  %s66_s3 = int_to_ptr.vmem [resolvable:$true] %s65_s3 }
   0xc   :  { %56 = dma.hbm_to_vmem [thread:$0]  %s49_s1, 2048, %s51_s18, [#allocation6], %s1281_s9, %s1281_s9, %s1282_s10  }
   0xd   :  { %71 = dma.hbm_to_vmem [thread:$0]  %s64_s16, 2048, %s66_s3, [#allocation9], %s1281_s9, %s1281_s9, %s1282_s10  }
   0xe   :  { %1272 = dma.done.wait [#allocation3], 256  }
   0xf   :  { %1273 = vsyncadd [#allocation3], 4294967040 }
  0x10   :  { %1274 = dma.done.wait [#allocation6], 2560  }
  0x11   :  { %1275 = vsyncadd [#allocation6], 4294964736 }
  0x12   :  { %1276 = dma.done.wait [#allocation9], 2048  }
  0x13   :  { %1277 = vsyncadd [#allocation9], 4294965248  ;;  %vm100_vm0 = vcmask 261120   ;;  %v95_v0 = vld [vmem:[#allocation5 + $0x18] sm:$0xff]  ;;  %v94_v1 = vld [vmem:[#allocation5 + $0x10] sm:$0xff]  ;;  %s1119_s26 = sshll.u32 %s1849_s7, 4  ;;  %s1120_s26 = int_to_ptr.hbm [resolvable:$true] %s1119_s26 }
  0x14   :  { %v93_v2 = vld [vmem:[#allocation5 + $0x8] sm:$0xff]  ;;  %v1351_v3 = vand.u32 4294901760, %v95_v0  ;;  %v1353_v4 = vand.u32 4294901760, %v94_v1  ;;  %v92_v6 = vld [vmem:[#allocation5] sm:$0xff]  ;;  %v91_v7 = vld [vmem:[#allocation2 + $0x8] sm:$0xff] }
  0x15   :  { %v1355_v5 = vand.u32 4294901760, %v93_v2  ;;  %v90_v8 = vld [vmem:[#allocation2] sm:$0xff]  ;;  %v1357_v9 = vand.u32 4294901760, %v92_v6  ;;  %v105_v10 = vsel %vm100_vm0, %v91_v7, 0  ;;  %v340_v16 = vld [vmem:[#allocation7 + $0x78] sm:$0xff]  ;;  %v338_v33 = vld [vmem:[#allocation7 + $0x68] sm:$0xff] }
  0x16   :  { %v102_v11 = vsel %vm100_vm0, %v90_v8, 0  ;;  %1134 = vmatpush.msra.mxu2 %v1351_v3  ;;  %v157_v12 = vsub.f32 %v95_v0, %v1351_v3  ;;  %v1361_v13 = vand.u32 4294901760, %v105_v10  ;;  %v163_v14 = vsub.f32 %v94_v1, %v1353_v4  ;;  %120 = vmatpush.msra.mxu0 %v1351_v3  ;;  %v339_v23 = vld [vmem:[#allocation7 + $0x70] sm:$0xff]  ;;  %v337_v39 = vld [vmem:[#allocation7 + $0x60] sm:$0xff]  ;;  %v336_v46 = vld [vmem:[#allocation7 + $0x58] sm:$0xff] }
  0x17   :  { %v169_v15 = vsub.f32 %v93_v2, %v1355_v5  ;;  %v1367_v17 = vsub.f32 %v92_v6, %v1357_v9  ;;  %v1369_v18 = vand.u32 4294901760, %v102_v11  ;;  %v1380_v26 = vand.u32 4294901760, %v340_v16  ;;  %v335_v49 = vld [vmem:[#allocation7 + $0x50] sm:$0xff]  ;;  %v334_v54 = vld [vmem:[#allocation7 + $0x48] sm:$0xff]  ;;  %v333_v57 = vld [vmem:[#allocation7 + $0x40] sm:$0xff] }
  0x18   :  { %1135 = vmatpush.msra.mxu2 %v1353_v4  ;;  %v158_v19 = vand.u32 4294901760, %v157_v12  ;;  %v1373_v20 = vsub.f32 %v105_v10, %v1361_v13  ;;  %v164_v21 = vand.u32 4294901760, %v163_v14  ;;  %122 = vmatpush.msra.mxu0 %v1353_v4  ;;  %v1386_v32 = vand.u32 4294901760, %v339_v23  ;;  %v332_v62 = vld [vmem:[#allocation7 + $0x38] sm:$0xff]  ;;  %v331_v6 = vld [vmem:[#allocation7 + $0x30] sm:$0xff] }
  0x19   :  { %v170_v22 = vand.u32 4294901760, %v169_v15  ;;  %v176_v24 = vand.u32 4294901760, %v1367_v17  ;;  %v1378_v25 = vsub.f32 %v102_v11, %v1369_v18  ;;  %v1400_v42 = vsub.f32 %v340_v16, %v1380_v26 }
  0x1a   :  { %1136 = vmatpush.msra.mxu2 %v1355_v5  ;;  %v159_v27 = vsub.f32 %v157_v12, %v158_v19  ;;  %v137_v28 = vand.u32 4294901760, %v1373_v20  ;;  %v165_v29 = vsub.f32 %v163_v14, %v164_v21  ;;  %124 = vmatpush.msra.mxu0 %v1355_v5  ;;  %v1402_v43 = vand.u32 4294901760, %v338_v33 }
  0x1b   :  { %v171_v30 = vsub.f32 %v169_v15, %v170_v22  ;;  %v129_v31 = vand.u32 4294901760, %v1378_v25  ;;  %v177_v37 = vsub.f32 %v1367_v17, %v176_v24  ;;  %v1405_v45 = vsub.f32 %v339_v23, %v1386_v32 }
  0x1c   :  { %1137 = vmatpush.msra.mxu2 %v1357_v9  ;;  %v160_v34 = vand.u32 4294901760, %v159_v27  ;;  %v138_v35 = vsub.f32 %v1373_v20, %v137_v28  ;;  %v166_v36 = vand.u32 4294901760, %v165_v29  ;;  %126 = vmatpush.msra.mxu0 %v1357_v9  ;;  %v1407_v48 = vand.u32 4294901760, %v337_v39 }
  0x1d   :  { %v130_v38 = vsub.f32 %v1378_v25, %v129_v31  ;;  %v172_v41 = vand.u32 4294901760, %v171_v30  ;;  %v178_v47 = vand.u32 4294901760, %v177_v37  ;;  %v396_v50 = vand.u32 4294901760, %v1400_v42 }
  0x1e   :  { %203 = vmatpush.msrb.mxu2 %v157_v12  ;;  %272 = vmatpush.msrb.mxu0 %v158_v19  ;;  %v139_v40 = vand.u32 4294901760, %v138_v35  ;;  %v1411_v51 = vsub.f32 %v338_v33, %v1402_v43  ;;  %v1413_v52 = vand.u32 4294901760, %v336_v46  ;;  %v402_v53 = vand.u32 4294901760, %v1405_v45  ;;  %v330_v12 = vld [vmem:[#allocation7 + $0x28] sm:$0xff] }
  0x1f   :  { %1138 = vmatpush.msra.mxu3 %v160_v34  ;;  %161 = vmatpush.msra.mxu1 %v160_v34  ;;  %v131_v44 = vand.u32 4294901760, %v130_v38  ;;  %v1418_v55 = vsub.f32 %v337_v39, %v1407_v48  ;;  %v1420_v56 = vand.u32 4294901760, %v335_v49  ;;  %v397_v58 = vsub.f32 %v1400_v42, %v396_v50 }
  0x20   :  { %206 = vmatpush.msrb.mxu2 %v163_v14  ;;  %276 = vmatpush.msrb.mxu0 %v164_v21  ;;  %v408_v59 = vand.u32 4294901760, %v1411_v51  ;;  %v1430_v60 = vsub.f32 %v336_v46, %v1413_v52  ;;  %v1432_v61 = vand.u32 4294901760, %v334_v54  ;;  %v403_v63 = vsub.f32 %v1405_v45, %v402_v53 }
  0x21   :  { %140 = vmatmul.f32.vlgmr.msra.gmra.mxu2 %v139_v40  ;;  %1139 = vmatpush.msra.mxu3 %v166_v36  ;;  %v414_v0 = vand.u32 4294901760, %v1418_v55  ;;  %v1444_v1 = vsub.f32 %v335_v49, %v1420_v56  ;;  %v1446_v2 = vand.u32 4294901760, %v333_v57  ;;  %v398_v7 = vand.u32 4294901760, %v397_v58 }
  0x22   :  { %209 = vmatpush.msrb.mxu2 %v169_v15  ;;  %167 = vmatpush.msra.mxu1 %v166_v36  ;;  %v409_v8 = vsub.f32 %v1411_v51, %v408_v59  ;;  %v420_v10 = vand.u32 4294901760, %v1430_v60  ;;  %v1459_v11 = vsub.f32 %v334_v54, %v1432_v61  ;;  %v1485_v23 = vand.u32 4294901760, %v330_v12 }
  0x23   :  { %1140 = vmatpush.msra.mxu3 %v172_v41  ;;  %132 = vmatmul.f32.vlgmr.msra.gmra.mxu0 %v131_v44  ;;  %v415_v14 = vsub.f32 %v1418_v55, %v414_v0  ;;  %v426_v15 = vand.u32 4294901760, %v1444_v1  ;;  %v1469_v16 = vsub.f32 %v333_v57, %v1446_v2  ;;  %v329_v44 = vld [vmem:[#allocation7 + $0x20] sm:$0xff]  ;;  %v327_v57 = vld [vmem:[#allocation7 + $0x10] sm:$0xff] }
  0x24   :  { %212 = vmatpush.msrb.mxu2 %v1367_v17  ;;  %173 = vmatpush.msra.mxu1 %v172_v41  ;;  %v1472_v17 = vand.u32 4294901760, %v331_v6  ;;  %v410_v19 = vand.u32 4294901760, %v409_v8  ;;  %v421_v21 = vsub.f32 %v1430_v60, %v420_v10  ;;  %v1550_v46 = vand.u32 4294901760, %v329_v44 }
  0x25   :  { %1141 = vmatpush.msra.mxu3 %v178_v47  ;;  %280 = vmatpush.msrb.mxu0 %v170_v22  ;;  %v432_v22 = vand.u32 4294901760, %v1459_v11 }
  0x26   :  { %185 = vmatmul.f32.vlgmr.msra.gmra.mxu3 %v1361_v13  ;;  %179 = vmatpush.msra.mxu1 %v178_v47  ;;  %v422_v27 = vand.u32 4294901760, %v421_v21  ;;  %v328_v47 = vld [vmem:[#allocation7 + $0x18] sm:$0xff]  ;;  %v1553_v49 = vsub.f32 %v329_v44, %v1550_v46 }
  0x27   :  { %237 = vmatpush.msrb.mxu3 %v1351_v3  ;;  %181 = vmatmul.f32.vlgmr.msra.gmra.mxu1 %v1369_v18  ;;  %v433_v29 = vsub.f32 %v1459_v11, %v432_v22  ;;  %v1555_v54 = vand.u32 4294901760, %v328_v47  ;;  %v730_v44 = vld [vmem:[#allocation8 + $0x58] sm:$0xff] }
  0x28   :  { %307 = vmatpush.msrb.mxu1 %v1351_v3  ;;  %284 = vmatpush.msrb.mxu0 %v176_v24  ;;  %v1450_v3 = vand.u32 4294901760, %v332_v62  ;;  %v438_v24 = vand.u32 4294901760, %v1469_v16  ;;  %v462_v58 = vand.u32 4294901760, %v1553_v49 }
  0x29   :  { %215 = vmatmul.f32.vlgmr.msrb.gmra.mxu2 %v1378_v25  ;;  %239 = vmatpush.msrb.mxu3 %v1353_v4  ;;  %v1495_v25 = vsub.f32 %v331_v6, %v1472_v17  ;;  %v434_v36 = vand.u32 4294901760, %v433_v29  ;;  %v326_v6 = vld [vmem:[#allocation7 + $0x8] sm:$0xff] }
  0x2a   :  { %309 = vmatpush.msrb.mxu1 %v1353_v4  ;;  %346 = vmatpush.msra.mxu2 %v1380_v26  ;;  %v404_v4 = vand.u32 4294901760, %v403_v63  ;;  %v439_v34 = vsub.f32 %v1469_v16, %v438_v24  ;;  %v1561_v63 = vand.u32 4294901760, %v327_v57 }
  0x2b   :  { %241 = vmatpush.msrb.mxu3 %v1355_v5  ;;  %286 = vmatmul.f32.vlgmr.msrb.gmra.mxu0 %v1369_v18  ;;  %v450_v35 = vand.u32 4294901760, %v1495_v25 }
  0x2c   :  { %311 = vmatpush.msrb.mxu1 %v1355_v5  ;;  %348 = vmatpush.msra.mxu2 %v1386_v32  ;;  %v1478_v5 = vsub.f32 %v332_v62, %v1450_v3  ;;  %v440_v39 = vand.u32 4294901760, %v439_v34  ;;  %v467_v62 = vsub.f32 %v328_v47, %v1555_v54 }
  0x2d   :  { %243 = vmatpush.msrb.mxu3 %v1357_v9  ;;  %501 = vmatpush.msra.mxu0 %v1400_v42 }
  0x2e   :  { %247 = vmatmul.f32.vlgmr.msrb.gmra.mxu3 %v129_v31  ;;  %313 = vmatpush.msrb.mxu1 %v1357_v9  ;;  %v416_v9 = vand.u32 4294901760, %v415_v14  ;;  %v444_v30 = vand.u32 4294901760, %v1478_v5  ;;  %v1505_v31 = vsub.f32 %v330_v12, %v1485_v23  ;;  %v468_v8 = vand.u32 4294901760, %v467_v62  ;;  %v325_v14 = vld [vmem:[#allocation7] sm:$0xff] }
  0x2f   :  { %315 = vmatmul.f32.vlgmr.msrb.gmra.mxu1 %v1369_v18  ;;  %399 = vmatpush.msra.mxu3 %v398_v7  ;;  %v427_v18 = vsub.f32 %v1444_v1, %v426_v15  ;;  %v463_v7 = vsub.f32 %v1553_v49, %v462_v58  ;;  %v1568_v12 = vand.u32 4294901760, %v326_v6 }
  0x30   :  { %350 = vmatpush.msra.mxu2 %v1402_v43  ;;  %504 = vmatpush.msra.mxu0 %v1405_v45  ;;  %v445_v37 = vsub.f32 %v1478_v5, %v444_v30  ;;  %v456_v38 = vand.u32 4294901760, %v1505_v31  ;;  %v469_v21 = vsub.f32 %v467_v62, %v468_v8 }
  0x31   :  { %220 = vmatmul.f32.gmra.mxu2 %v1373_v20  ;;  %405 = vmatpush.msra.mxu3 %v404_v4  ;;  %v428_v33 = vand.u32 4294901760, %v427_v18  ;;  %v451_v20 = vsub.f32 %v1495_v25, %v450_v35  ;;  %v473_v4 = vsub.f32 %v327_v57, %v1561_v63  ;;  %v479_v18 = vsub.f32 %v326_v6, %v1568_v12 }
  0x32   :  { %352 = vmatpush.msra.mxu2 %v1407_v48  ;;  %559 = vmatpush.msra.mxu1 %v1380_v26  ;;  %v470_v29 = vand.u32 4294901760, %v469_v21 }
  0x33   :  { %290 = vmatmul.f32.gmra.mxu0 %v1361_v13  ;;  %411 = vmatpush.msra.mxu3 %v410_v19  ;;  %v452_v40 = vand.u32 4294901760, %v451_v20  ;;  %v464_v19 = vand.u32 4294901760, %v463_v7  ;;  %v480_v34 = vand.u32 4294901760, %v479_v18 }
  0x34   :  { %354 = vmatpush.msra.mxu2 %v1413_v52  ;;  %507 = vmatpush.msra.mxu0 %v1411_v51 }
  0x35   :  { %417 = vmatpush.msra.mxu3 %v416_v9  ;;  %561 = vmatpush.msra.mxu1 %v1386_v32  ;;  %v474_v9 = vand.u32 4294901760, %v473_v4 }
  0x36   :  { %253 = vmatmul.f32.gmra.mxu3 %v137_v28  ;;  %356 = vmatpush.msra.mxu2 %v1420_v56  ;;  %v457_v28 = vsub.f32 %v1505_v31, %v456_v38 }
  0x37   :  { %319 = vmatmul.f32.gmra.mxu1 %v1361_v13  ;;  %423 = vmatpush.msra.mxu3 %v422_v27  ;;  %v446_v13 = vand.u32 4294901760, %v445_v37  ;;  %v375_v27 = vand.u32 4294901760, %v325_v14 }
  0x38   :  { %358 = vmatpush.msra.mxu2 %v1432_v61  ;;  %510 = vmatpush.msra.mxu0 %v1418_v55  ;;  %v458_v41 = vand.u32 4294901760, %v457_v28 }
  0x39   :  { %429 = vmatpush.msra.mxu3 %v428_v33  ;;  %563 = vmatpush.msra.mxu1 %v1402_v43  ;;  %v475_v33 = vsub.f32 %v473_v4, %v474_v9 }
  0x3a   :  { %360 = vmatpush.msra.mxu2 %v1446_v2  ;;  %513 = vmatpush.msra.mxu0 %v1430_v60 }
  0x3b   :  { %435 = vmatpush.msra.mxu3 %v434_v36  ;;  %565 = vmatpush.msra.mxu1 %v1407_v48  ;;  %v485_v36 = vsub.f32 %v325_v14, %v375_v27  ;;  %v476_v37 = vand.u32 4294901760, %v475_v33 }
  0x3c   :  { %362 = vmatpush.msra.mxu2 %v1450_v3  ;;  %516 = vmatpush.msra.mxu0 %v1444_v1 }
  0x3d   :  { %441 = vmatpush.msra.mxu3 %v440_v39  ;;  %567 = vmatpush.msra.mxu1 %v1413_v52  ;;  %v481_v39 = vsub.f32 %v479_v18, %v480_v34  ;;  %v486_v20 = vand.u32 4294901760, %v485_v36 }
  0x3e   :  { %364 = vmatpush.msra.mxu2 %v1472_v17  ;;  %519 = vmatpush.msra.mxu0 %v1459_v11 }
  0x3f   :  { %447 = vmatpush.msra.mxu3 %v446_v13  ;;  %569 = vmatpush.msra.mxu1 %v1420_v56  ;;  %v482_v13 = vand.u32 4294901760, %v481_v39  ;;  %v487_v28 = vsub.f32 %v485_v36, %v486_v20 }
  0x40   :  { %366 = vmatpush.msra.mxu2 %v1485_v23  ;;  %522 = vmatpush.msra.mxu0 %v1469_v16 }
  0x41   :  { %453 = vmatpush.msra.mxu3 %v452_v40  ;;  %571 = vmatpush.msra.mxu1 %v1432_v61  ;;  %v488_v40 = vand.u32 4294901760, %v487_v28 }
  0x42   :  { %525 = vmatpush.msra.mxu0 %v1478_v5  ;;  %368 = vmatpush.msra.mxu2 %v1550_v46 }
  0x43   :  { %459 = vmatpush.msra.mxu3 %v458_v41  ;;  %573 = vmatpush.msra.mxu1 %v1446_v2  ;;  %v731_v41 = vld [vmem:[#allocation8 + $0x60] sm:$0xff] }
  0x44   :  { %528 = vmatpush.msra.mxu0 %v1495_v25  ;;  %370 = vmatpush.msra.mxu2 %v1555_v54  ;;  %v733_v25 = vld [vmem:[#allocation8 + $0x70] sm:$0xff] }
  0x45   :  { %575 = vmatpush.msra.mxu1 %v1450_v3  ;;  %465 = vmatpush.msra.mxu3 %v464_v19 }
  0x46   :  { %531 = vmatpush.msra.mxu0 %v1505_v31  ;;  %372 = vmatpush.msra.mxu2 %v1561_v63 }
  0x47   :  { %577 = vmatpush.msra.mxu1 %v1472_v17  ;;  %471 = vmatpush.msra.mxu3 %v470_v29 }
  0x48   :  { %534 = vmatpush.msra.mxu0 %v1553_v49  ;;  %374 = vmatpush.msra.mxu2 %v1568_v12  ;;  %v1625_v49 = vand.u32 4294901760, %v731_v41 }
  0x49   :  { %579 = vmatpush.msra.mxu1 %v1485_v23  ;;  %477 = vmatpush.msra.mxu3 %v476_v37 }
  0x4a   :  { %537 = vmatpush.msra.mxu0 %v467_v62  ;;  %376 = vmatpush.msra.mxu2 %v375_v27  ;;  %v1641_v7 = vsub.f32 %v731_v41, %v1625_v49 }
  0x4b   :  { %581 = vmatpush.msra.mxu1 %v1550_v46  ;;  %483 = vmatpush.msra.mxu3 %v482_v13 }
  0x4c   :  { %540 = vmatpush.msra.mxu0 %v473_v4  ;;  %606 = vmatpush.msrb.mxu2 %v396_v50 }
  0x4d   :  { %583 = vmatpush.msra.mxu1 %v1555_v54  ;;  %489 = vmatpush.msra.mxu3 %v488_v40 }
  0x4e   :  { %543 = vmatpush.msra.mxu0 %v479_v18  ;;  %610 = vmatpush.msrb.mxu2 %v402_v53 }
  0x4f   :  { %585 = vmatpush.msra.mxu1 %v1561_v63  ;;  %677 = vmatpush.msrb.mxu3 %v1380_v26 }
  0x50   :  { %546 = vmatpush.msra.mxu0 %v485_v36  ;;  %614 = vmatpush.msrb.mxu2 %v408_v59 }
  0x51   :  { %587 = vmatpush.msra.mxu1 %v1568_v12  ;;  %679 = vmatpush.msrb.mxu3 %v1386_v32  ;;  %v1149_v32 = vld [vmem:[%s1844_s2] ss:$0 sm:$0xff] }
  0x52   :  { %618 = vmatpush.msrb.mxu2 %v414_v0 }
  0x53   :  { %589 = vmatpush.msra.mxu1 %v375_v27  ;;  %681 = vmatpush.msrb.mxu3 %v1402_v43 }
  0x54   :  { %622 = vmatpush.msrb.mxu2 %v420_v10 }
  0x55   :  { %683 = vmatpush.msrb.mxu3 %v1407_v48 }
  0x56   :  { %626 = vmatpush.msrb.mxu2 %v426_v15 }
  0x57   :  { %685 = vmatpush.msrb.mxu3 %v1413_v52 }
  0x58   :  { %630 = vmatpush.msrb.mxu2 %v432_v22 }
  0x59   :  { %687 = vmatpush.msrb.mxu3 %v1420_v56 }
  0x5a   :  { %634 = vmatpush.msrb.mxu2 %v438_v24  ;;  %v734_v24 = vld [vmem:[#allocation8 + $0x78] sm:$0xff] }
  0x5b   :  { %689 = vmatpush.msrb.mxu3 %v1432_v61  ;;  %v1619_v31 = vand.u32 4294901760, %v734_v24 }
  0x5c   :  { %638 = vmatpush.msrb.mxu2 %v444_v30  ;;  %v732_v30 = vld [vmem:[#allocation8 + $0x68] sm:$0xff] }
  0x5d   :  { %691 = vmatpush.msrb.mxu3 %v1446_v2  ;;  %v1630_v57 = vsub.f32 %v734_v24, %v1619_v31  ;;  %740 = vmatpush.msrb.mxu0 %v1619_v31 }
  0x5e   :  { %642 = vmatpush.msrb.mxu2 %v450_v35  ;;  %v1621_v35 = vand.u32 4294901760, %v733_v25 }
  0x5f   :  { %693 = vmatpush.msrb.mxu3 %v1450_v3  ;;  %v790_v4 = vand.u32 4294901760, %v1630_v57 }
  0x60   :  { %646 = vmatpush.msrb.mxu2 %v456_v38  ;;  %v1623_v38 = vand.u32 4294901760, %v732_v30  ;;  %742 = vmatpush.msrb.mxu0 %v1621_v35 }
  0x61   :  { %695 = vmatpush.msrb.mxu3 %v1472_v17  ;;  %v791_v18 = vsub.f32 %v1630_v57, %v790_v4 }
  0x62   :  { %650 = vmatpush.msrb.mxu2 %v462_v58  ;;  %v1633_v58 = vsub.f32 %v733_v25, %v1621_v35  ;;  %v1636_v62 = vsub.f32 %v732_v30, %v1623_v38  ;;  %744 = vmatpush.msrb.mxu0 %v1623_v38  ;;  %v723_v30 = vld [vmem:[#allocation8 + $0x20] sm:$0xff] }
  0x63   :  { %697 = vmatpush.msrb.mxu3 %v1485_v23  ;;  %v792_v36 = vand.u32 4294901760, %v791_v18 }
  0x64   :  { %654 = vmatpush.msrb.mxu2 %v468_v8  ;;  %v802_v14 = vand.u32 4294901760, %v1636_v62  ;;  %746 = vmatpush.msrb.mxu0 %v1625_v49 }
  0x65   :  { %699 = vmatpush.msrb.mxu3 %v1550_v46  ;;  %793 = vmatpush.msrb.mxu1 %v792_v36 }
  0x66   :  { %658 = vmatpush.msrb.mxu2 %v474_v9  ;;  %v808_v9 = vand.u32 4294901760, %v1641_v7  ;;  %v803_v29 = vsub.f32 %v1636_v62, %v802_v14 }
  0x67   :  { %701 = vmatpush.msrb.mxu3 %v1555_v54  ;;  %v1627_v54 = vand.u32 4294901760, %v730_v44 }
  0x68   :  { %662 = vmatpush.msrb.mxu2 %v480_v34  ;;  %v809_v39 = vsub.f32 %v1641_v7, %v808_v9  ;;  %v804_v13 = vand.u32 4294901760, %v803_v29 }
  0x69   :  { %703 = vmatpush.msrb.mxu3 %v1561_v63  ;;  %v1644_v8 = vsub.f32 %v730_v44, %v1627_v54  ;;  %748 = vmatpush.msrb.mxu0 %v1627_v54 }
  0x6a   :  { %666 = vmatpush.msrb.mxu2 %v486_v20 }
  0x6b   :  { %705 = vmatpush.msrb.mxu3 %v1568_v12  ;;  %v796_v12 = vand.u32 4294901760, %v1633_v58  ;;  %v814_v33 = vand.u32 4294901760, %v1644_v8 }
  0x6d   :  { %707 = vmatpush.msrb.mxu3 %v375_v27  ;;  %v797_v27 = vsub.f32 %v1633_v58, %v796_v12  ;;  %v815_v28 = vsub.f32 %v1644_v8, %v814_v33 }
  0x6f   :  { %v798_v37 = vand.u32 4294901760, %v797_v27 }
  0x71   :  { %799 = vmatpush.msrb.mxu1 %v798_v37 }
  0x73   :  { %805 = vmatpush.msrb.mxu1 %v804_v13 }
  0xa0   :  { %v133_v26 = vpop.f32.mrf.mxu0 }
  0xa1   :  { %v134_v43 = vadd.f32 %v1149_v32, %v133_v26  ;;  %v810_v26 = vand.u32 4294901760, %v809_v39 }
  0xa3   :  { %811 = vmatpush.msrb.mxu1 %v810_v26 }
  0xa4   :  { %v141_v42 = vpop.f32.mrf.mxu2  ;;  %v182_v45 = vpop.f32.mrf.mxu1 }
  0xa5   :  { %v183_v50 = vadd.f32 %v182_v45, %v134_v43  ;;  %v142_v59 = vadd.f32 %v1149_v32, %v141_v42  ;;  %v816_v42 = vand.u32 4294901760, %v815_v28  ;;  %v729_v43 = vld [vmem:[#allocation8 + $0x50] sm:$0xff]  ;;  %v720_v28 = vld [vmem:[#allocation8 + $0x8] sm:$0xff] }
  0xa6   :  { %v1681_v45 = vand.u32 4294901760, %v729_v43 }
  0xa7   :  { %817 = vmatpush.msrb.mxu1 %v816_v42 }
  0xa8   :  { %v287_v53 = vpop.f32.mrf.mxu0  ;;  %750 = vmatpush.msrb.mxu0 %v1681_v45 }
  0xa9   :  { %v186_v48 = vpop.f32.mrf.mxu3 }
  0xaa   :  { %v187_v1 = vadd.f32 %v186_v48, %v142_v59  ;;  %v728_v48 = vld [vmem:[#allocation8 + $0x48] sm:$0xff]  ;;  %v726_v59 = vld [vmem:[#allocation8 + $0x38] sm:$0xff] }
  0xac   :  { %v216_v51 = vpop.f32.mrf.mxu2  ;;  %v316_v56 = vpop.f32.mrf.mxu1 }
  0xad   :  { %v217_v52 = vadd.f32 %v216_v51, %v183_v50  ;;  %v1684_v50 = vsub.f32 %v729_v43, %v1681_v45  ;;  %v1686_v51 = vand.u32 4294901760, %v728_v48  ;;  %v1776_v43 = vand.u32 4294901760, %v720_v28 }
  0xaf   :  { %752 = vmatpush.msrb.mxu0 %v1686_v51 }
  0xb0   :  { %v291_v15 = vpop.f32.mrf.mxu0 }
  0xb1   :  { %v248_v55 = vpop.f32.mrf.mxu3 }
  0xb2   :  { %v249_v60 = vadd.f32 %v248_v55, %v217_v52  ;;  %v727_v52 = vld [vmem:[#allocation8 + $0x40] sm:$0xff]  ;;  %v1692_v55 = vsub.f32 %v728_v48, %v1686_v51 }
  0xb3   :  { %v719_v48 = vld [vmem:[#allocation8] sm:$0xff] }
  0xb4   :  { %v288_v61 = vadd.f32 %v287_v53, %v249_v60  ;;  %v221_v0 = vpop.f32.mrf.mxu2  ;;  %v320_v5 = vpop.f32.mrf.mxu1  ;;  %v820_v53 = vand.u32 4294901760, %v1684_v50 }
  0xb5   :  { %v222_v3 = vadd.f32 %v221_v0, %v187_v1  ;;  %v1706_v1 = vand.u32 4294901760, %v726_v59 }
  0xb6   :  { %v317_v2 = vadd.f32 %v316_v56, %v288_v61  ;;  %v1694_v56 = vand.u32 4294901760, %v727_v52  ;;  %v821_v60 = vsub.f32 %v1684_v50, %v820_v53  ;;  %v826_v61 = vand.u32 4294901760, %v1692_v55 }
  0xb8   :  { %v323_v10 = vmax.f32 %v317_v2, 0.0  ;;  %v1704_v0 = vsub.f32 %v727_v52, %v1694_v56  ;;  %754 = vmatpush.msrb.mxu0 %v1694_v56  ;;  %v725_v2 = vld [vmem:[#allocation8 + $0x30] sm:$0xff] }
  0xb9   :  { %v254_v11 = vpop.f32.mrf.mxu3 }
  0xba   :  { %v1615_v16 = vand.u32 4294901760, %v323_v10  ;;  %v255_v17 = vadd.f32 %v254_v11, %v222_v3  ;;  %v822_v3 = vand.u32 4294901760, %v821_v60  ;;  %v832_v11 = vand.u32 4294901760, %v1704_v0  ;;  %756 = vmatpush.msrb.mxu0 %v1706_v1 }
  0xbc   :  { %v378_v22 = vsub.f32 %v323_v10, %v1615_v16  ;;  %v292_v23 = vadd.f32 %v291_v15, %v255_v17  ;;  %491 = vmatmul.f32.vlgmr.msra.gmra.mxu3 %v1615_v16  ;;  %v827_v10 = vsub.f32 %v1692_v55, %v826_v61  ;;  %v1716_v15 = vsub.f32 %v726_v59, %v1706_v1  ;;  %v724_v17 = vld [vmem:[#allocation8 + $0x28] sm:$0xff] }
  0xbd   :  { %953 = vmatpush.msra.mxu3 %v1619_v31  ;;  %823 = vmatpush.msrb.mxu1 %v822_v3  ;;  %v1727_v24 = vand.u32 4294901760, %v724_v17  ;;  %v873_v3 = vsub.f32 %v720_v28, %v1776_v43 }
  0xbe   :  { %v379_v46 = vand.u32 4294901760, %v378_v22  ;;  %v321_v47 = vadd.f32 %v320_v5, %v292_v23  ;;  %549 = vmatmul.f32.vlgmr.msra.gmra.mxu0 %v378_v22  ;;  %v828_v5 = vand.u32 4294901760, %v827_v10  ;;  %v838_v23 = vand.u32 4294901760, %v1716_v15 }
  0xbf   :  { %955 = vmatpush.msra.mxu3 %v1621_v35 }
  0xc0   :  { %v380_v63 = vsub.f32 %v378_v22, %v379_v46  ;;  %v324_v6 = vmax.f32 %v321_v47, 0.0  ;;  %593 = vmatmul.f32.vlgmr.msra.gmra.mxu1 %v379_v46  ;;  %v833_v22 = vsub.f32 %v1704_v0, %v832_v11  ;;  %v839_v44 = vsub.f32 %v1716_v15, %v838_v23 }
  0xc1   :  { %957 = vmatpush.msra.mxu3 %v1623_v38  ;;  %829 = vmatpush.msrb.mxu1 %v828_v5  ;;  %v1739_v46 = vsub.f32 %v724_v17, %v1727_v24  ;;  %v1741_v47 = vand.u32 4294901760, %v723_v30 }
  0xc2   :  { %v385_v19 = vand.u32 4294901760, %v324_v6  ;;  %v381_v21 = vand.u32 4294901760, %v380_v63  ;;  %v834_v41 = vand.u32 4294901760, %v833_v22  ;;  %v874_v22 = vand.u32 4294901760, %v873_v3 }
  0xc3   :  { %959 = vmatpush.msra.mxu3 %v1625_v49  ;;  %v1748_v18 = vsub.f32 %v723_v30, %v1741_v47 }
  0xc4   :  { %v386_v34 = vsub.f32 %v324_v6, %v385_v19  ;;  %382 = vmatmul.f32.vlgmr.msra.gmra.mxu2 %v381_v21  ;;  %495 = vmatmul.f32.gmra.mxu3 %v385_v19  ;;  %v722_v6 = vld [vmem:[#allocation8 + $0x18] sm:$0xff]  ;;  %v850_v21 = vand.u32 4294901760, %v1739_v46 }
  0xc5   :  { %895 = vmatpush.msra.mxu2 %v1630_v57  ;;  %961 = vmatpush.msra.mxu3 %v1627_v54  ;;  %v1750_v27 = vand.u32 4294901760, %v722_v6  ;;  %v856_v37 = vand.u32 4294901760, %v1748_v18 }
  0xc6   :  { %554 = vmatmul.f32.gmra.mxu0 %v386_v34  ;;  %v387_v20 = vand.u32 4294901760, %v386_v34  ;;  %835 = vmatpush.msrb.mxu1 %v834_v41  ;;  %v851_v36 = vsub.f32 %v1739_v46, %v850_v21 }
  0xc7   :  { %898 = vmatpush.msra.mxu2 %v1633_v58  ;;  %963 = vmatpush.msra.mxu3 %v1681_v45  ;;  %v1763_v39 = vsub.f32 %v722_v6, %v1750_v27  ;;  %v857_v26 = vsub.f32 %v1748_v18, %v856_v37 }
  0xc8   :  { %599 = vmatmul.f32.gmra.mxu1 %v387_v20  ;;  %v388_v40 = vsub.f32 %v386_v34, %v387_v20  ;;  %v721_v34 = vld [vmem:[#allocation8 + $0x10] sm:$0xff] }
  0xc9   :  { %901 = vmatpush.msra.mxu2 %v1636_v62  ;;  %965 = vmatpush.msra.mxu3 %v1686_v51  ;;  %v1765_v20 = vand.u32 4294901760, %v721_v34  ;;  %v858_v52 = vand.u32 4294901760, %v857_v26 }
  0xca   :  { %v389_v32 = vand.u32 4294901760, %v388_v40  ;;  %v852_v40 = vand.u32 4294901760, %v851_v36 }
  0xcb   :  { %904 = vmatpush.msra.mxu2 %v1641_v7  ;;  %967 = vmatpush.msra.mxu3 %v1694_v56  ;;  %v867_v42 = vsub.f32 %v721_v34, %v1765_v20 }
  0xcc   :  { %390 = vmatmul.f32.gmra.mxu2 %v389_v32  ;;  %709 = vmatmul.f32.vlgmr.msrb.gmra.mxu3 %v1615_v16  ;;  %v862_v32 = vand.u32 4294901760, %v1763_v39 }
  0xcd   :  { %907 = vmatpush.msra.mxu2 %v1644_v8  ;;  %969 = vmatpush.msra.mxu3 %v1706_v1  ;;  %v868_v60 = vand.u32 4294901760, %v867_v42 }
  0xce   :  { %v863_v59 = vsub.f32 %v1763_v39, %v862_v32 }
  0xcf   :  { %910 = vmatpush.msra.mxu2 %v1684_v50  ;;  %v869_v17 = vsub.f32 %v867_v42, %v868_v60 }
  0xd0   :  { %v864_v10 = vand.u32 4294901760, %v863_v59 }
  0xd1   :  { %913 = vmatpush.msra.mxu2 %v1692_v55  ;;  %v870_v30 = vand.u32 4294901760, %v869_v17 }
  0xd3   :  { %916 = vmatpush.msra.mxu2 %v1704_v0 }
  0xd4   :  { %668 = vmatmul.f32.vlgmr.msrb.gmra.mxu2 %v1615_v16  ;;  %713 = vmatmul.f32.gmra.mxu3 %v385_v19  ;;  %v1720_v16 = vand.u32 4294901760, %v725_v2 }
  0xd5   :  { %919 = vmatpush.msra.mxu2 %v1716_v15 }
  0xd6   :  { %v1731_v25 = vsub.f32 %v725_v2, %v1720_v16  ;;  %758 = vmatpush.msrb.mxu0 %v1720_v16  ;;  %971 = vmatpush.msra.mxu3 %v1720_v16  ;;  %v1780_v2 = vand.u32 4294901760, %v719_v48 }
  0xd8   :  { %v844_v63 = vand.u32 4294901760, %v1731_v25  ;;  %760 = vmatpush.msrb.mxu0 %v1727_v24  ;;  %922 = vmatpush.msra.mxu2 %v1731_v25  ;;  %v879_v5 = vsub.f32 %v719_v48, %v1780_v2 }
  0xd9   :  { %973 = vmatpush.msra.mxu3 %v1727_v24 }
  0xda   :  { %v845_v29 = vsub.f32 %v1731_v25, %v844_v63  ;;  %762 = vmatpush.msrb.mxu0 %v1741_v47  ;;  %925 = vmatpush.msra.mxu2 %v1739_v46  ;;  %v880_v41 = vand.u32 4294901760, %v879_v5 }
  0xdb   :  { %975 = vmatpush.msra.mxu3 %v1741_v47 }
  0xdc   :  { %672 = vmatmul.f32.gmra.mxu2 %v385_v19  ;;  %v840_v19 = vand.u32 4294901760, %v839_v44  ;;  %v846_v13 = vand.u32 4294901760, %v845_v29  ;;  %764 = vmatpush.msrb.mxu0 %v1750_v27  ;;  %v875_v44 = vsub.f32 %v873_v3, %v874_v22  ;;  %v881_v6 = vsub.f32 %v879_v5, %v880_v41 }
  0xdd   :  { %928 = vmatpush.msra.mxu2 %v1748_v18  ;;  %977 = vmatpush.msra.mxu3 %v1750_v27 }
  0xde   :  { %841 = vmatpush.msrb.mxu1 %v840_v19  ;;  %766 = vmatpush.msrb.mxu0 %v1765_v20  ;;  %v876_v19 = vand.u32 4294901760, %v875_v44  ;;  %v882_v29 = vand.u32 4294901760, %v881_v6 }
  0xdf   :  { %931 = vmatpush.msra.mxu2 %v1763_v39  ;;  %979 = vmatpush.msra.mxu3 %v1765_v20 }
  0xe0   :  { %847 = vmatpush.msrb.mxu1 %v846_v13  ;;  %768 = vmatpush.msrb.mxu0 %v1776_v43 }
  0xe1   :  { %934 = vmatpush.msra.mxu2 %v867_v42  ;;  %981 = vmatpush.msra.mxu3 %v1776_v43 }
  0xe2   :  { %853 = vmatpush.msrb.mxu1 %v852_v40  ;;  %770 = vmatpush.msrb.mxu0 %v1780_v2 }
  0xe3   :  { %937 = vmatpush.msra.mxu2 %v873_v3  ;;  %983 = vmatpush.msra.mxu3 %v1780_v2 }
  0xe4   :  { %859 = vmatpush.msrb.mxu1 %v858_v52  ;;  %1000 = vmatpush.msra.mxu0 %v790_v4 }
  0xe5   :  { %940 = vmatpush.msra.mxu2 %v879_v5 }
  0xe6   :  { %865 = vmatpush.msrb.mxu1 %v864_v10  ;;  %1004 = vmatpush.msra.mxu0 %v796_v12 }
  0xe8   :  { %871 = vmatpush.msrb.mxu1 %v870_v30  ;;  %1008 = vmatpush.msra.mxu0 %v802_v14 }
  0xea   :  { %877 = vmatpush.msrb.mxu1 %v876_v19  ;;  %1012 = vmatpush.msra.mxu0 %v808_v9 }
  0xec   :  { %883 = vmatpush.msrb.mxu1 %v882_v29  ;;  %1016 = vmatpush.msra.mxu0 %v814_v33 }
  0xee   :  { %1071 = vmatpush.msra.mxu1 %v1619_v31  ;;  %1020 = vmatpush.msra.mxu0 %v820_v53 }
  0xf0   :  { %1073 = vmatpush.msra.mxu1 %v1621_v35  ;;  %1024 = vmatpush.msra.mxu0 %v826_v61  ;;  %v1150_v35 = vld [vmem:[%s1846_s4] ss:$0 sm:$0xff] }
  0xf2   :  { %1075 = vmatpush.msra.mxu1 %v1623_v38  ;;  %1028 = vmatpush.msra.mxu0 %v832_v11 }
  0xf4   :  { %1077 = vmatpush.msra.mxu1 %v1625_v49  ;;  %1032 = vmatpush.msra.mxu0 %v838_v23 }
  0xf6   :  { %1079 = vmatpush.msra.mxu1 %v1627_v54  ;;  %1036 = vmatpush.msra.mxu0 %v844_v63 }
  0xf8   :  { %1081 = vmatpush.msra.mxu1 %v1681_v45  ;;  %1040 = vmatpush.msra.mxu0 %v850_v21 }
  0xfa   :  { %1083 = vmatpush.msra.mxu1 %v1686_v51  ;;  %1044 = vmatpush.msra.mxu0 %v856_v37  ;;  %v1151_v37 = vld [vmem:[%s1848_s6] ss:$0 sm:$0xff]  ;;  %s1286_s6 = smov [#allocation10]  }
  0xfb   :  { %s1117_s23 = sshll.u32 %s1286_s6, 4  ;;  %s1118_s23 = int_to_ptr.vmem [resolvable:$true] %s1117_s23 }
  0xfc   :  { %1085 = vmatpush.msra.mxu1 %v1694_v56  ;;  %1048 = vmatpush.msra.mxu0 %v862_v32 }
  0xfe   :  { %1087 = vmatpush.msra.mxu1 %v1706_v1  ;;  %1052 = vmatpush.msra.mxu0 %v868_v60 }
 0x100   :  { %1089 = vmatpush.msra.mxu1 %v1720_v16  ;;  %1056 = vmatpush.msra.mxu0 %v874_v22 }
 0x102   :  { %1091 = vmatpush.msra.mxu1 %v1727_v24  ;;  %1060 = vmatpush.msra.mxu0 %v880_v41 }
 0x104   :  { %1093 = vmatpush.msra.mxu1 %v1741_v47 }
 0x106   :  { %1095 = vmatpush.msra.mxu1 %v1750_v27 }
 0x108   :  { %1097 = vmatpush.msra.mxu1 %v1765_v20 }
 0x10a   :  { %1099 = vmatpush.msra.mxu1 %v1776_v43 }
 0x10c   :  { %1101 = vmatpush.msra.mxu1 %v1780_v2 }
 0x13b   :  { %v550_v58 = vpop.f32.mrf.mxu0 }
 0x13d   :  { %v594_v4 = vpop.f32.mrf.mxu1 }
 0x13f   :  { %v492_v31 = vpop.f32.mrf.mxu3 }
 0x143   :  { %v555_v50 = vpop.f32.mrf.mxu0 }
 0x145   :  { %v600_v56 = vpop.f32.mrf.mxu1 }
 0x147   :  { %v383_v38 = vpop.f32.mrf.mxu2  ;;  %v496_v54 = vpop.f32.mrf.mxu3 }
 0x148   :  { %v384_v49 = vadd.f32 %v1150_v35, %v383_v38 }
 0x14a   :  { %v493_v57 = vadd.f32 %v492_v31, %v384_v49 }
 0x14c   :  { %v551_v8 = vadd.f32 %v550_v58, %v493_v57 }
 0x14e   :  { %v595_v14 = vadd.f32 %v594_v4, %v551_v8 }
 0x14f   :  { %v391_v62 = vpop.f32.mrf.mxu2  ;;  %v710_v9 = vpop.f32.mrf.mxu3 }
 0x150   :  { %v392_v7 = vadd.f32 %v1150_v35, %v391_v62 }
 0x152   :  { %v497_v12 = vadd.f32 %v496_v54, %v392_v7 }
 0x154   :  { %v556_v53 = vadd.f32 %v555_v50, %v497_v12 }
 0x156   :  { %v601_v0 = vadd.f32 %v600_v56, %v556_v53 }
 0x157   :  { %v669_v33 = vpop.f32.mrf.mxu2  ;;  %v714_v16 = vpop.f32.mrf.mxu3 }
 0x158   :  { %v670_v45 = vadd.f32 %v669_v33, %v595_v14 }
 0x15a   :  { %v711_v51 = vadd.f32 %v710_v9, %v670_v45 }
 0x15c   :  { %v717_v55 = vmax.f32 %v711_v51, 0.0 }
 0x15e   :  { %v771_v61 = vand.u32 4294901760, %v717_v55 }
 0x15f   :  { %v673_v1 = vpop.f32.mrf.mxu2 }
 0x160   :  { %v772_v11 = vsub.f32 %v717_v55, %v771_v61  ;;  %v674_v15 = vadd.f32 %v673_v1, %v601_v0  ;;  %885 = vmatmul.f32.vlgmr.msrb.gmra.mxu1 %v771_v61 }
 0x162   :  { %v715_v23 = vadd.f32 %v714_v16, %v674_v15  ;;  %943 = vmatmul.f32.vlgmr.msra.gmra.mxu2 %v772_v11  ;;  %v773_v24 = vand.u32 4294901760, %v772_v11 }
 0x164   :  { %v718_v25 = vmax.f32 %v715_v23, 0.0  ;;  %987 = vmatmul.f32.vlgmr.msra.gmra.mxu3 %v773_v24  ;;  %v774_v46 = vsub.f32 %v772_v11, %v773_v24 }
 0x166   :  { %v779_v47 = vand.u32 4294901760, %v718_v25  ;;  %v775_v63 = vand.u32 4294901760, %v774_v46 }
 0x168   :  { %776 = vmatmul.f32.vlgmr.msrb.gmra.mxu0 %v775_v63  ;;  %889 = vmatmul.f32.gmra.mxu1 %v779_v47  ;;  %v780_v21 = vsub.f32 %v718_v25, %v779_v47 }
 0x16a   :  { %948 = vmatmul.f32.gmra.mxu2 %v780_v21  ;;  %v781_v18 = vand.u32 4294901760, %v780_v21 }
 0x16c   :  { %993 = vmatmul.f32.gmra.mxu3 %v781_v18  ;;  %v782_v27 = vsub.f32 %v780_v21, %v781_v18 }
 0x16e   :  { %v783_v34 = vand.u32 4294901760, %v782_v27 }
 0x170   :  { %784 = vmatmul.f32.gmra.mxu0 %v783_v34  ;;  %1103 = vmatmul.f32.vlgmr.msra.gmra.mxu1 %v771_v61 }
 0x178   :  { %1062 = vmatmul.f32.vlgmr.msra.gmra.mxu0 %v771_v61  ;;  %1107 = vmatmul.f32.gmra.mxu1 %v779_v47 }
 0x180   :  { %1066 = vmatmul.f32.gmra.mxu0 %v779_v47 }
 0x1dd   :  { %v886_v36 = vpop.f32.mrf.mxu1 }
 0x1e5   :  { %v777_v39 = vpop.f32.mrf.mxu0  ;;  %v890_v13 = vpop.f32.mrf.mxu1 }
 0x1e6   :  { %v778_v20 = vadd.f32 %v1151_v37, %v777_v39  ;;  %v944_v40 = vpop.f32.mrf.mxu2 }
 0x1e7   :  { %v988_v43 = vpop.f32.mrf.mxu3 }
 0x1e8   :  { %v887_v28 = vadd.f32 %v886_v36, %v778_v20 }
 0x1ea   :  { %v945_v32 = vadd.f32 %v944_v40, %v887_v28 }
 0x1ec   :  { %v989_v48 = vadd.f32 %v988_v43, %v945_v32 }
 0x1ed   :  { %v785_v26 = vpop.f32.mrf.mxu0  ;;  %v1104_v59 = vpop.f32.mrf.mxu1 }
 0x1ee   :  { %v786_v42 = vadd.f32 %v1151_v37, %v785_v26  ;;  %v949_v3 = vpop.f32.mrf.mxu2 }
 0x1ef   :  { %v994_v5 = vpop.f32.mrf.mxu3 }
 0x1f0   :  { %v891_v52 = vadd.f32 %v890_v13, %v786_v42 }
 0x1f2   :  { %v950_v10 = vadd.f32 %v949_v3, %v891_v52 }
 0x1f4   :  { %v995_v22 = vadd.f32 %v994_v5, %v950_v10 }
 0x1f5   :  { %v1063_v60 = vpop.f32.mrf.mxu0  ;;  %v1108_v44 = vpop.f32.mrf.mxu1 }
 0x1f6   :  { %v1064_v2 = vadd.f32 %v1063_v60, %v989_v48 }
 0x1f8   :  { %v1105_v17 = vadd.f32 %v1104_v59, %v1064_v2 }
 0x1fa   :  { %1111 = vst [vmem:[#allocation10] sm:$0xff] %v1105_v17 }
 0x1fd   :  { %v1067_v30 = vpop.f32.mrf.mxu0 }
 0x1fe   :  { %v1068_v41 = vadd.f32 %v1067_v30, %v995_v22 }
 0x200   :  { %v1109_v6 = vadd.f32 %v1108_v44, %v1068_v41 }
 0x202   :  { %1112 = vst [vmem:[#allocation10 + $0x8] sm:$0xff] %v1109_v6 }
 0x203   :  { %1125 = dma.vmem_to_hbm [thread:$0]  %s1118_s23, 256, %s1120_s26, [#allocation4], %s1281_s9, %s1281_s9, %s1282_s10  }
 0x204   :  { %1278 = dma.done.wait [#allocation4], 256  }
 0x205   :  { %1279 = vsyncadd [#allocation4], 4294967040 }
 0x206   :  { %1130 = vsyncpa [#allocation3], 1 }
 0x207   :  { %1131 = vsyncpa [#allocation6], 1 }
 0x208   :  { %1132 = vsyncpa [#allocation9], 1 }
 0x209   :  { %1133 = vsyncpa [#allocation4], 1 }

// kernel: tpu_custom_call.1
= control target key start
LH: loop header
LB: loop body
LE: loop exit
PB: predicated region body
PF: predicated region fallthrough
CT: control target
= control target key end

     0   :  { %12 = vsyncpa [#allocation3], 0  ;;  %s1842_s0 = inlined_call_operand.hbm [shape: f32[16,32], index: 0, kind: input, shape index: {}]   ;;  %s1843_s1 = inlined_call_operand.hbm [shape: f32[32,128], index: 1, kind: input, shape index: {}]   ;;  %s1844_s2 = inlined_call_operand.vmem [shape: f32[1,128], index: 2, kind: input, shape index: {}]   ;;  %s1845_s3 = inlined_call_operand.hbm [shape: f32[128,128], index: 3, kind: input, shape index: {}]   ;;  %s1846_s4 = inlined_call_operand.vmem [shape: f32[1,128], index: 4, kind: input, shape index: {}]   ;;  %s1847_s5 = inlined_call_operand.hbm [shape: f32[128,128], index: 5, kind: input, shape index: {}]   ;;  %s1848_s6 = inlined_call_operand.vmem [shape: f32[1,128], index: 6, kind: input, shape index: {}]   ;;  %s1849_s7 = inlined_call_operand.hbm [shape: f32[16,128], index: 7, kind: output, shape index: {}]  }
   0x1   :  { %13 = vsyncpa [#allocation6], 0 }
   0x2   :  { %14 = vsyncpa [#allocation9], 0 }
   0x3   :  { %15 = vsyncpa [#allocation4], 0  ;;  %s33_s26 = sshll.u32 %s1843_s1, 4  ;;  %s1280_s27 = smov [#allocation5]   ;;  %s34_s26 = int_to_ptr.hbm [resolvable:$true] %s33_s26 }
   0x4   :  { %s35_s28 = sshll.u32 %s1280_s27, 4  ;;  %s20_s8 = sshll.u32 %s1842_s0, 4  ;;  %s36_s28 = int_to_ptr.vmem [resolvable:$true] %s35_s28  ;;  %s21_s8 = int_to_ptr.hbm [resolvable:$true] %s20_s8 }
   0x5   :  { %s1281_s9 = smov 128   ;;  %s1282_s10 = smov 8  }
   0x6   :  { %41 = dma.hbm_to_vmem [thread:$0]  %s34_s26, 512, %s36_s28, [#allocation6], %s1281_s9, %s1281_s9, %s1282_s10  }
   0x7   :  { %s1283_s11 = smov [#allocation2]   ;;  %s48_s1 = sshll.u32 %s1845_s3, 4  ;;  %s49_s1 = int_to_ptr.hbm [resolvable:$true] %s48_s1 }
   0x8   :  { %s22_s12 = sshll.u32 %s1283_s11, 4  ;;  %s63_s16 = sshll.u32 %s1847_s5, 4  ;;  %s23_s12 = int_to_ptr.vmem [resolvable:$true] %s22_s12  ;;  %s64_s16 = int_to_ptr.hbm [resolvable:$true] %s63_s16 }
   0x9   :  { %28 = dma.hbm_to_vmem [thread:$0]  %s21_s8, 256, %s23_s12, [#allocation3], %s1281_s9, %s1281_s9, %s1282_s10  }
   0xa   :  { %s1284_s17 = smov [#allocation7]   ;;  %s1285_s19 = smov [#allocation8]  }
   0xb   :  { %s50_s18 = sshll.u32 %s1284_s17, 4  ;;  %s65_s3 = sshll.u32 %s1285_s19, 4  ;;  %s51_s18 = int_to_ptr.vmem [resolvable:$true] %s50_s18  ;;  %s66_s3 = int_to_ptr.vmem [resolvable:$true] %s65_s3 }
   0xc   :  { %56 = dma.hbm_to_vmem [thread:$0]  %s49_s1, 2048, %s51_s18, [#allocation6], %s1281_s9, %s1281_s9, %s1282_s10  }
   0xd   :  { %71 = dma.hbm_to_vmem [thread:$0]  %s64_s16, 2048, %s66_s3, [#allocation9], %s1281_s9, %s1281_s9, %s1282_s10  }
   0xe   :  { %1272 = dma.done.wait [#allocation3], 256  }
   0xf   :  { %1273 = vsyncadd [#allocation3], 4294967040 }
  0x10   :  { %1274 = dma.done.wait [#allocation6], 2560  }
  0x11   :  { %1275 = vsyncadd [#allocation6], 4294964736 }
  0x12   :  { %1276 = dma.done.wait [#allocation9], 2048  }
  0x13   :  { %1277 = vsyncadd [#allocation9], 4294965248  ;;  %vm100_vm0 = vcmask 261120   ;;  %v95_v0 = vld [vmem:[#allocation5 + $0x18] sm:$0xff]  ;;  %v94_v1 = vld [vmem:[#allocation5 + $0x10] sm:$0xff]  ;;  %s1119_s26 = sshll.u32 %s1849_s7, 4  ;;  %s1120_s26 = int_to_ptr.hbm [resolvable:$true] %s1119_s26 }
  0x14   :  { %v93_v2 = vld [vmem:[#allocation5 + $0x8] sm:$0xff]  ;;  %v1351_v3 = vand.u32 4294901760, %v95_v0  ;;  %v1353_v4 = vand.u32 4294901760, %v94_v1  ;;  %v92_v6 = vld [vmem:[#allocation5] sm:$0xff]  ;;  %v91_v7 = vld [vmem:[#allocation2 + $0x8] sm:$0xff] }
  0x15   :  { %v1355_v5 = vand.u32 4294901760, %v93_v2  ;;  %v90_v8 = vld [vmem:[#allocation2] sm:$0xff]  ;;  %v1357_v9 = vand.u32 4294901760, %v92_v6  ;;  %v105_v10 = vsel %vm100_vm0, %v91_v7, 0  ;;  %v340_v16 = vld [vmem:[#allocation7 + $0x78] sm:$0xff]  ;;  %v338_v33 = vld [vmem:[#allocation7 + $0x68] sm:$0xff] }
  0x16   :  { %v102_v11 = vsel %vm100_vm0, %v90_v8, 0  ;;  %1134 = vmatpush.msra.mxu2 %v1351_v3  ;;  %v157_v12 = vsub.f32 %v95_v0, %v1351_v3  ;;  %v1361_v13 = vand.u32 4294901760, %v105_v10  ;;  %v163_v14 = vsub.f32 %v94_v1, %v1353_v4  ;;  %120 = vmatpush.msra.mxu0 %v1351_v3  ;;  %v339_v23 = vld [vmem:[#allocation7 + $0x70] sm:$0xff]  ;;  %v337_v39 = vld [vmem:[#allocation7 + $0x60] sm:$0xff]  ;;  %v336_v46 = vld [vmem:[#allocation7 + $0x58] sm:$0xff] }
  0x17   :  { %v169_v15 = vsub.f32 %v93_v2, %v1355_v5  ;;  %v1367_v17 = vsub.f32 %v92_v6, %v1357_v9  ;;  %v1369_v18 = vand.u32 4294901760, %v102_v11  ;;  %v1380_v26 = vand.u32 4294901760, %v340_v16  ;;  %v335_v49 = vld [vmem:[#allocation7 + $0x50] sm:$0xff]  ;;  %v334_v54 = vld [vmem:[#allocation7 + $0x48] sm:$0xff]  ;;  %v333_v57 = vld [vmem:[#allocation7 + $0x40] sm:$0xff] }
  0x18   :  { %1135 = vmatpush.msra.mxu2 %v1353_v4  ;;  %v158_v19 = vand.u32 4294901760, %v157_v12  ;;  %v1373_v20 = vsub.f32 %v105_v10, %v1361_v13  ;;  %v164_v21 = vand.u32 4294901760, %v163_v14  ;;  %122 = vmatpush.msra.mxu0 %v1353_v4  ;;  %v1386_v32 = vand.u32 4294901760, %v339_v23  ;;  %v332_v62 = vld [vmem:[#allocation7 + $0x38] sm:$0xff]  ;;  %v331_v6 = vld [vmem:[#allocation7 + $0x30] sm:$0xff] }
  0x19   :  { %v170_v22 = vand.u32 4294901760, %v169_v15  ;;  %v176_v24 = vand.u32 4294901760, %v1367_v17  ;;  %v1378_v25 = vsub.f32 %v102_v11, %v1369_v18  ;;  %v1400_v42 = vsub.f32 %v340_v16, %v1380_v26 }
  0x1a   :  { %1136 = vmatpush.msra.mxu2 %v1355_v5  ;;  %v159_v27 = vsub.f32 %v157_v12, %v158_v19  ;;  %v137_v28 = vand.u32 4294901760, %v1373_v20  ;;  %v165_v29 = vsub.f32 %v163_v14, %v164_v21  ;;  %124 = vmatpush.msra.mxu0 %v1355_v5  ;;  %v1402_v43 = vand.u32 4294901760, %v338_v33 }
  0x1b   :  { %v171_v30 = vsub.f32 %v169_v15, %v170_v22  ;;  %v129_v31 = vand.u32 4294901760, %v1378_v25  ;;  %v177_v37 = vsub.f32 %v1367_v17, %v176_v24  ;;  %v1405_v45 = vsub.f32 %v339_v23, %v1386_v32 }
  0x1c   :  { %1137 = vmatpush.msra.mxu2 %v1357_v9  ;;  %v160_v34 = vand.u32 4294901760, %v159_v27  ;;  %v138_v35 = vsub.f32 %v1373_v20, %v137_v28  ;;  %v166_v36 = vand.u32 4294901760, %v165_v29  ;;  %126 = vmatpush.msra.mxu0 %v1357_v9  ;;  %v1407_v48 = vand.u32 4294901760, %v337_v39 }
  0x1d   :  { %v130_v38 = vsub.f32 %v1378_v25, %v129_v31  ;;  %v172_v41 = vand.u32 4294901760, %v171_v30  ;;  %v178_v47 = vand.u32 4294901760, %v177_v37  ;;  %v396_v50 = vand.u32 4294901760, %v1400_v42 }
  0x1e   :  { %203 = vmatpush.msrb.mxu2 %v157_v12  ;;  %272 = vmatpush.msrb.mxu0 %v158_v19  ;;  %v139_v40 = vand.u32 4294901760, %v138_v35  ;;  %v1411_v51 = vsub.f32 %v338_v33, %v1402_v43  ;;  %v1413_v52 = vand.u32 4294901760, %v336_v46  ;;  %v402_v53 = vand.u32 4294901760, %v1405_v45  ;;  %v330_v12 = vld [vmem:[#allocation7 + $0x28] sm:$0xff] }
  0x1f   :  { %1138 = vmatpush.msra.mxu3 %v160_v34  ;;  %161 = vmatpush.msra.mxu1 %v160_v34  ;;  %v131_v44 = vand.u32 4294901760, %v130_v38  ;;  %v1418_v55 = vsub.f32 %v337_v39, %v1407_v48  ;;  %v1420_v56 = vand.u32 4294901760, %v335_v49  ;;  %v397_v58 = vsub.f32 %v1400_v42, %v396_v50 }
  0x20   :  { %206 = vmatpush.msrb.mxu2 %v163_v14  ;;  %276 = vmatpush.msrb.mxu0 %v164_v21  ;;  %v408_v59 = vand.u32 4294901760, %v1411_v51  ;;  %v1430_v60 = vsub.f32 %v336_v46, %v1413_v52  ;;  %v1432_v61 = vand.u32 4294901760, %v334_v54  ;;  %v403_v63 = vsub.f32 %v1405_v45, %v402_v53 }
  0x21   :  { %140 = vmatmul.f32.vlgmr.msra.gmra.mxu2 %v139_v40  ;;  %1139 = vmatpush.msra.mxu3 %v166_v36  ;;  %v414_v0 = vand.u32 4294901760, %v1418_v55  ;;  %v1444_v1 = vsub.f32 %v335_v49, %v1420_v56  ;;  %v1446_v2 = vand.u32 4294901760, %v333_v57  ;;  %v398_v7 = vand.u32 4294901760, %v397_v58 }
  0x22   :  { %209 = vmatpush.msrb.mxu2 %v169_v15  ;;  %167 = vmatpush.msra.mxu1 %v166_v36  ;;  %v409_v8 = vsub.f32 %v1411_v51, %v408_v59  ;;  %v420_v10 = vand.u32 4294901760, %v1430_v60  ;;  %v1459_v11 = vsub.f32 %v334_v54, %v1432_v61  ;;  %v1485_v23 = vand.u32 4294901760, %v330_v12 }
  0x23   :  { %1140 = vmatpush.msra.mxu3 %v172_v41  ;;  %132 = vmatmul.f32.vlgmr.msra.gmra.mxu0 %v131_v44  ;;  %v415_v14 = vsub.f32 %v1418_v55, %v414_v0  ;;  %v426_v15 = vand.u32 4294901760, %v1444_v1  ;;  %v1469_v16 = vsub.f32 %v333_v57, %v1446_v2  ;;  %v329_v44 = vld [vmem:[#allocation7 + $0x20] sm:$0xff]  ;;  %v327_v57 = vld [vmem:[#allocation7 + $0x10] sm:$0xff] }
  0x24   :  { %212 = vmatpush.msrb.mxu2 %v1367_v17  ;;  %173 = vmatpush.msra.mxu1 %v172_v41  ;;  %v1472_v17 = vand.u32 4294901760, %v331_v6  ;;  %v410_v19 = vand.u32 4294901760, %v409_v8  ;;  %v421_v21 = vsub.f32 %v1430_v60, %v420_v10  ;;  %v1550_v46 = vand.u32 4294901760, %v329_v44 }
  0x25   :  { %1141 = vmatpush.msra.mxu3 %v178_v47  ;;  %280 = vmatpush.msrb.mxu0 %v170_v22  ;;  %v432_v22 = vand.u32 4294901760, %v1459_v11 }
  0x26   :  { %185 = vmatmul.f32.vlgmr.msra.gmra.mxu3 %v1361_v13  ;;  %179 = vmatpush.msra.mxu1 %v178_v47  ;;  %v422_v27 = vand.u32 4294901760, %v421_v21  ;;  %v328_v47 = vld [vmem:[#allocation7 + $0x18] sm:$0xff]  ;;  %v1553_v49 = vsub.f32 %v329_v44, %v1550_v46 }
  0x27   :  { %237 = vmatpush.msrb.mxu3 %v1351_v3  ;;  %181 = vmatmul.f32.vlgmr.msra.gmra.mxu1 %v1369_v18  ;;  %v433_v29 = vsub.f32 %v1459_v11, %v432_v22  ;;  %v1555_v54 = vand.u32 4294901760, %v328_v47  ;;  %v730_v44 = vld [vmem:[#allocation8 + $0x58] sm:$0xff] }
  0x28   :  { %307 = vmatpush.msrb.mxu1 %v1351_v3  ;;  %284 = vmatpush.msrb.mxu0 %v176_v24  ;;  %v1450_v3 = vand.u32 4294901760, %v332_v62  ;;  %v438_v24 = vand.u32 4294901760, %v1469_v16  ;;  %v462_v58 = vand.u32 4294901760, %v1553_v49 }
  0x29   :  { %215 = vmatmul.f32.vlgmr.msrb.gmra.mxu2 %v1378_v25  ;;  %239 = vmatpush.msrb.mxu3 %v1353_v4  ;;  %v1495_v25 = vsub.f32 %v331_v6, %v1472_v17  ;;  %v434_v36 = vand.u32 4294901760, %v433_v29  ;;  %v326_v6 = vld [vmem:[#allocation7 + $0x8] sm:$0xff] }
  0x2a   :  { %309 = vmatpush.msrb.mxu1 %v1353_v4  ;;  %346 = vmatpush.msra.mxu2 %v1380_v26  ;;  %v404_v4 = vand.u32 4294901760, %v403_v63  ;;  %v439_v34 = vsub.f32 %v1469_v16, %v438_v24  ;;  %v1561_v63 = vand.u32 4294901760, %v327_v57 }
  0x2b   :  { %241 = vmatpush.msrb.mxu3 %v1355_v5  ;;  %286 = vmatmul.f32.vlgmr.msrb.gmra.mxu0 %v1369_v18  ;;  %v450_v35 = vand.u32 4294901760, %v1495_v25 }
  0x2c   :  { %311 = vmatpush.msrb.mxu1 %v1355_v5  ;;  %348 = vmatpush.msra.mxu2 %v1386_v32  ;;  %v1478_v5 = vsub.f32 %v332_v62, %v1450_v3  ;;  %v440_v39 = vand.u32 4294901760, %v439_v34  ;;  %v467_v62 = vsub.f32 %v328_v47, %v1555_v54 }
  0x2d   :  { %243 = vmatpush.msrb.mxu3 %v1357_v9  ;;  %501 = vmatpush.msra.mxu0 %v1400_v42 }
  0x2e   :  { %247 = vmatmul.f32.vlgmr.msrb.gmra.mxu3 %v129_v31  ;;  %313 = vmatpush.msrb.mxu1 %v1357_v9  ;;  %v416_v9 = vand.u32 4294901760, %v415_v14  ;;  %v444_v30 = vand.u32 4294901760, %v1478_v5  ;;  %v1505_v31 = vsub.f32 %v330_v12, %v1485_v23  ;;  %v468_v8 = vand.u32 4294901760, %v467_v62  ;;  %v325_v14 = vld [vmem:[#allocation7] sm:$0xff] }
  0x2f   :  { %315 = vmatmul.f32.vlgmr.msrb.gmra.mxu1 %v1369_v18  ;;  %399 = vmatpush.msra.mxu3 %v398_v7  ;;  %v427_v18 = vsub.f32 %v1444_v1, %v426_v15  ;;  %v463_v7 = vsub.f32 %v1553_v49, %v462_v58  ;;  %v1568_v12 = vand.u32 4294901760, %v326_v6 }
  0x30   :  { %350 = vmatpush.msra.mxu2 %v1402_v43  ;;  %504 = vmatpush.msra.mxu0 %v1405_v45  ;;  %v445_v37 = vsub.f32 %v1478_v5, %v444_v30  ;;  %v456_v38 = vand.u32 4294901760, %v1505_v31  ;;  %v469_v21 = vsub.f32 %v467_v62, %v468_v8 }
  0x31   :  { %220 = vmatmul.f32.gmra.mxu2 %v1373_v20  ;;  %405 = vmatpush.msra.mxu3 %v404_v4  ;;  %v428_v33 = vand.u32 4294901760, %v427_v18  ;;  %v451_v20 = vsub.f32 %v1495_v25, %v450_v35  ;;  %v473_v4 = vsub.f32 %v327_v57, %v1561_v63  ;;  %v479_v18 = vsub.f32 %v326_v6, %v1568_v12 }
  0x32   :  { %352 = vmatpush.msra.mxu2 %v1407_v48  ;;  %559 = vmatpush.msra.mxu1 %v1380_v26  ;;  %v470_v29 = vand.u32 4294901760, %v469_v21 }
  0x33   :  { %290 = vmatmul.f32.gmra.mxu0 %v1361_v13  ;;  %411 = vmatpush.msra.mxu3 %v410_v19  ;;  %v452_v40 = vand.u32 4294901760, %v451_v20  ;;  %v464_v19 = vand.u32 4294901760, %v463_v7  ;;  %v480_v34 = vand.u32 4294901760, %v479_v18 }
  0x34   :  { %354 = vmatpush.msra.mxu2 %v1413_v52  ;;  %507 = vmatpush.msra.mxu0 %v1411_v51 }
  0x35   :  { %417 = vmatpush.msra.mxu3 %v416_v9  ;;  %561 = vmatpush.msra.mxu1 %v1386_v32  ;;  %v474_v9 = vand.u32 4294901760, %v473_v4 }
  0x36   :  { %253 = vmatmul.f32.gmra.mxu3 %v137_v28  ;;  %356 = vmatpush.msra.mxu2 %v1420_v56  ;;  %v457_v28 = vsub.f32 %v1505_v31, %v456_v38 }
  0x37   :  { %319 = vmatmul.f32.gmra.mxu1 %v1361_v13  ;;  %423 = vmatpush.msra.mxu3 %v422_v27  ;;  %v446_v13 = vand.u32 4294901760, %v445_v37  ;;  %v375_v27 = vand.u32 4294901760, %v325_v14 }
  0x38   :  { %358 = vmatpush.msra.mxu2 %v1432_v61  ;;  %510 = vmatpush.msra.mxu0 %v1418_v55  ;;  %v458_v41 = vand.u32 4294901760, %v457_v28 }
  0x39   :  { %429 = vmatpush.msra.mxu3 %v428_v33  ;;  %563 = vmatpush.msra.mxu1 %v1402_v43  ;;  %v475_v33 = vsub.f32 %v473_v4, %v474_v9 }
  0x3a   :  { %360 = vmatpush.msra.mxu2 %v1446_v2  ;;  %513 = vmatpush.msra.mxu0 %v1430_v60 }
  0x3b   :  { %435 = vmatpush.msra.mxu3 %v434_v36  ;;  %565 = vmatpush.msra.mxu1 %v1407_v48  ;;  %v485_v36 = vsub.f32 %v325_v14, %v375_v27  ;;  %v476_v37 = vand.u32 4294901760, %v475_v33 }
  0x3c   :  { %362 = vmatpush.msra.mxu2 %v1450_v3  ;;  %516 = vmatpush.msra.mxu0 %v1444_v1 }
  0x3d   :  { %441 = vmatpush.msra.mxu3 %v440_v39  ;;  %567 = vmatpush.msra.mxu1 %v1413_v52  ;;  %v481_v39 = vsub.f32 %v479_v18, %v480_v34  ;;  %v486_v20 = vand.u32 4294901760, %v485_v36 }
  0x3e   :  { %364 = vmatpush.msra.mxu2 %v1472_v17  ;;  %519 = vmatpush.msra.mxu0 %v1459_v11 }
  0x3f   :  { %447 = vmatpush.msra.mxu3 %v446_v13  ;;  %569 = vmatpush.msra.mxu1 %v1420_v56  ;;  %v482_v13 = vand.u32 4294901760, %v481_v39  ;;  %v487_v28 = vsub.f32 %v485_v36, %v486_v20 }
  0x40   :  { %366 = vmatpush.msra.mxu2 %v1485_v23  ;;  %522 = vmatpush.msra.mxu0 %v1469_v16 }
  0x41   :  { %453 = vmatpush.msra.mxu3 %v452_v40  ;;  %571 = vmatpush.msra.mxu1 %v1432_v61  ;;  %v488_v40 = vand.u32 4294901760, %v487_v28 }
  0x42   :  { %525 = vmatpush.msra.mxu0 %v1478_v5  ;;  %368 = vmatpush.msra.mxu2 %v1550_v46 }
  0x43   :  { %459 = vmatpush.msra.mxu3 %v458_v41  ;;  %573 = vmatpush.msra.mxu1 %v1446_v2  ;;  %v731_v41 = vld [vmem:[#allocation8 + $0x60] sm:$0xff] }
  0x44   :  { %528 = vmatpush.msra.mxu0 %v1495_v25  ;;  %370 = vmatpush.msra.mxu2 %v1555_v54  ;;  %v733_v25 = vld [vmem:[#allocation8 + $0x70] sm:$0xff] }
  0x45   :  { %575 = vmatpush.msra.mxu1 %v1450_v3  ;;  %465 = vmatpush.msra.mxu3 %v464_v19 }
  0x46   :  { %531 = vmatpush.msra.mxu0 %v1505_v31  ;;  %372 = vmatpush.msra.mxu2 %v1561_v63 }
  0x47   :  { %577 = vmatpush.msra.mxu1 %v1472_v17  ;;  %471 = vmatpush.msra.mxu3 %v470_v29 }
  0x48   :  { %534 = vmatpush.msra.mxu0 %v1553_v49  ;;  %374 = vmatpush.msra.mxu2 %v1568_v12  ;;  %v1625_v49 = vand.u32 4294901760, %v731_v41 }
  0x49   :  { %579 = vmatpush.msra.mxu1 %v1485_v23  ;;  %477 = vmatpush.msra.mxu3 %v476_v37 }
  0x4a   :  { %537 = vmatpush.msra.mxu0 %v467_v62  ;;  %376 = vmatpush.msra.mxu2 %v375_v27  ;;  %v1641_v7 = vsub.f32 %v731_v41, %v1625_v49 }
  0x4b   :  { %581 = vmatpush.msra.mxu1 %v1550_v46  ;;  %483 = vmatpush.msra.mxu3 %v482_v13 }
  0x4c   :  { %540 = vmatpush.msra.mxu0 %v473_v4  ;;  %606 = vmatpush.msrb.mxu2 %v396_v50 }
  0x4d   :  { %583 = vmatpush.msra.mxu1 %v1555_v54  ;;  %489 = vmatpush.msra.mxu3 %v488_v40 }
  0x4e   :  { %543 = vmatpush.msra.mxu0 %v479_v18  ;;  %610 = vmatpush.msrb.mxu2 %v402_v53 }
  0x4f   :  { %585 = vmatpush.msra.mxu1 %v1561_v63  ;;  %677 = vmatpush.msrb.mxu3 %v1380_v26 }
  0x50   :  { %546 = vmatpush.msra.mxu0 %v485_v36  ;;  %614 = vmatpush.msrb.mxu2 %v408_v59 }
  0x51   :  { %587 = vmatpush.msra.mxu1 %v1568_v12  ;;  %679 = vmatpush.msrb.mxu3 %v1386_v32  ;;  %v1149_v32 = vld [vmem:[%s1844_s2] ss:$0 sm:$0xff] }
  0x52   :  { %618 = vmatpush.msrb.mxu2 %v414_v0 }
  0x53   :  { %589 = vmatpush.msra.mxu1 %v375_v27  ;;  %681 = vmatpush.msrb.mxu3 %v1402_v43 }
  0x54   :  { %622 = vmatpush.msrb.mxu2 %v420_v10 }
  0x55   :  { %683 = vmatpush.msrb.mxu3 %v1407_v48 }
  0x56   :  { %626 = vmatpush.msrb.mxu2 %v426_v15 }
  0x57   :  { %685 = vmatpush.msrb.mxu3 %v1413_v52 }
  0x58   :  { %630 = vmatpush.msrb.mxu2 %v432_v22 }
  0x59   :  { %687 = vmatpush.msrb.mxu3 %v1420_v56 }
  0x5a   :  { %634 = vmatpush.msrb.mxu2 %v438_v24  ;;  %v734_v24 = vld [vmem:[#allocation8 + $0x78] sm:$0xff] }
  0x5b   :  { %689 = vmatpush.msrb.mxu3 %v1432_v61  ;;  %v1619_v31 = vand.u32 4294901760, %v734_v24 }
  0x5c   :  { %638 = vmatpush.msrb.mxu2 %v444_v30  ;;  %v732_v30 = vld [vmem:[#allocation8 + $0x68] sm:$0xff] }
  0x5d   :  { %691 = vmatpush.msrb.mxu3 %v1446_v2  ;;  %v1630_v57 = vsub.f32 %v734_v24, %v1619_v31  ;;  %740 = vmatpush.msrb.mxu0 %v1619_v31 }
  0x5e   :  { %642 = vmatpush.msrb.mxu2 %v450_v35  ;;  %v1621_v35 = vand.u32 4294901760, %v733_v25 }
  0x5f   :  { %693 = vmatpush.msrb.mxu3 %v1450_v3  ;;  %v790_v4 = vand.u32 4294901760, %v1630_v57 }
  0x60   :  { %646 = vmatpush.msrb.mxu2 %v456_v38  ;;  %v1623_v38 = vand.u32 4294901760, %v732_v30  ;;  %742 = vmatpush.msrb.mxu0 %v1621_v35 }
  0x61   :  { %695 = vmatpush.msrb.mxu3 %v1472_v17  ;;  %v791_v18 = vsub.f32 %v1630_v57, %v790_v4 }
  0x62   :  { %650 = vmatpush.msrb.mxu2 %v462_v58  ;;  %v1633_v58 = vsub.f32 %v733_v25, %v1621_v35  ;;  %v1636_v62 = vsub.f32 %v732_v30, %v1623_v38  ;;  %744 = vmatpush.msrb.mxu0 %v1623_v38  ;;  %v723_v30 = vld [vmem:[#allocation8 + $0x20] sm:$0xff] }
  0x63   :  { %697 = vmatpush.msrb.mxu3 %v1485_v23  ;;  %v792_v36 = vand.u32 4294901760, %v791_v18 }
  0x64   :  { %654 = vmatpush.msrb.mxu2 %v468_v8  ;;  %v802_v14 = vand.u32 4294901760, %v1636_v62  ;;  %746 = vmatpush.msrb.mxu0 %v1625_v49 }
  0x65   :  { %699 = vmatpush.msrb.mxu3 %v1550_v46  ;;  %793 = vmatpush.msrb.mxu1 %v792_v36 }
  0x66   :  { %658 = vmatpush.msrb.mxu2 %v474_v9  ;;  %v808_v9 = vand.u32 4294901760, %v1641_v7  ;;  %v803_v29 = vsub.f32 %v1636_v62, %v802_v14 }
  0x67   :  { %701 = vmatpush.msrb.mxu3 %v1555_v54  ;;  %v1627_v54 = vand.u32 4294901760, %v730_v44 }
  0x68   :  { %662 = vmatpush.msrb.mxu2 %v480_v34  ;;  %v809_v39 = vsub.f32 %v1641_v7, %v808_v9  ;;  %v804_v13 = vand.u32 4294901760, %v803_v29 }
  0x69   :  { %703 = vmatpush.msrb.mxu3 %v1561_v63  ;;  %v1644_v8 = vsub.f32 %v730_v44, %v1627_v54  ;;  %748 = vmatpush.msrb.mxu0 %v1627_v54 }
  0x6a   :  { %666 = vmatpush.msrb.mxu2 %v486_v20 }
  0x6b   :  { %705 = vmatpush.msrb.mxu3 %v1568_v12  ;;  %v796_v12 = vand.u32 4294901760, %v1633_v58  ;;  %v814_v33 = vand.u32 4294901760, %v1644_v8 }
  0x6d   :  { %707 = vmatpush.msrb.mxu3 %v375_v27  ;;  %v797_v27 = vsub.f32 %v1633_v58, %v796_v12  ;;  %v815_v28 = vsub.f32 %v1644_v8, %v814_v33 }
  0x6f   :  { %v798_v37 = vand.u32 4294901760, %v797_v27 }
  0x71   :  { %799 = vmatpush.msrb.mxu1 %v798_v37 }
  0x73   :  { %805 = vmatpush.msrb.mxu1 %v804_v13 }
  0xa0   :  { %v133_v26 = vpop.f32.mrf.mxu0 }
  0xa1   :  { %v134_v43 = vadd.f32 %v1149_v32, %v133_v26  ;;  %v810_v26 = vand.u32 4294901760, %v809_v39 }
  0xa3   :  { %811 = vmatpush.msrb.mxu1 %v810_v26 }
  0xa4   :  { %v141_v42 = vpop.f32.mrf.mxu2  ;;  %v182_v45 = vpop.f32.mrf.mxu1 }
  0xa5   :  { %v183_v50 = vadd.f32 %v182_v45, %v134_v43  ;;  %v142_v59 = vadd.f32 %v1149_v32, %v141_v42  ;;  %v816_v42 = vand.u32 4294901760, %v815_v28  ;;  %v729_v43 = vld [vmem:[#allocation8 + $0x50] sm:$0xff]  ;;  %v720_v28 = vld [vmem:[#allocation8 + $0x8] sm:$0xff] }
  0xa6   :  { %v1681_v45 = vand.u32 4294901760, %v729_v43 }
  0xa7   :  { %817 = vmatpush.msrb.mxu1 %v816_v42 }
  0xa8   :  { %v287_v53 = vpop.f32.mrf.mxu0  ;;  %750 = vmatpush.msrb.mxu0 %v1681_v45 }
  0xa9   :  { %v186_v48 = vpop.f32.mrf.mxu3 }
  0xaa   :  { %v187_v1 = vadd.f32 %v186_v48, %v142_v59  ;;  %v728_v48 = vld [vmem:[#allocation8 + $0x48] sm:$0xff]  ;;  %v726_v59 = vld [vmem:[#allocation8 + $0x38] sm:$0xff] }
  0xac   :  { %v216_v51 = vpop.f32.mrf.mxu2  ;;  %v316_v56 = vpop.f32.mrf.mxu1 }
  0xad   :  { %v217_v52 = vadd.f32 %v216_v51, %v183_v50  ;;  %v1684_v50 = vsub.f32 %v729_v43, %v1681_v45  ;;  %v1686_v51 = vand.u32 4294901760, %v728_v48  ;;  %v1776_v43 = vand.u32 4294901760, %v720_v28 }
  0xaf   :  { %752 = vmatpush.msrb.mxu0 %v1686_v51 }
  0xb0   :  { %v291_v15 = vpop.f32.mrf.mxu0 }
  0xb1   :  { %v248_v55 = vpop.f32.mrf.mxu3 }
  0xb2   :  { %v249_v60 = vadd.f32 %v248_v55, %v217_v52  ;;  %v727_v52 = vld [vmem:[#allocation8 + $0x40] sm:$0xff]  ;;  %v1692_v55 = vsub.f32 %v728_v48, %v1686_v51 }
  0xb3   :  { %v719_v48 = vld [vmem:[#allocation8] sm:$0xff] }
  0xb4   :  { %v288_v61 = vadd.f32 %v287_v53, %v249_v60  ;;  %v221_v0 = vpop.f32.mrf.mxu2  ;;  %v320_v5 = vpop.f32.mrf.mxu1  ;;  %v820_v53 = vand.u32 4294901760, %v1684_v50 }
  0xb5   :  { %v222_v3 = vadd.f32 %v221_v0, %v187_v1  ;;  %v1706_v1 = vand.u32 4294901760, %v726_v59 }
  0xb6   :  { %v317_v2 = vadd.f32 %v316_v56, %v288_v61  ;;  %v1694_v56 = vand.u32 4294901760, %v727_v52  ;;  %v821_v60 = vsub.f32 %v1684_v50, %v820_v53  ;;  %v826_v61 = vand.u32 4294901760, %v1692_v55 }
  0xb8   :  { %v323_v10 = vmax.f32 %v317_v2, 0.0  ;;  %v1704_v0 = vsub.f32 %v727_v52, %v1694_v56  ;;  %754 = vmatpush.msrb.mxu0 %v1694_v56  ;;  %v725_v2 = vld [vmem:[#allocation8 + $0x30] sm:$0xff] }
  0xb9   :  { %v254_v11 = vpop.f32.mrf.mxu3 }
  0xba   :  { %v1615_v16 = vand.u32 4294901760, %v323_v10  ;;  %v255_v17 = vadd.f32 %v254_v11, %v222_v3  ;;  %v822_v3 = vand.u32 4294901760, %v821_v60  ;;  %v832_v11 = vand.u32 4294901760, %v1704_v0  ;;  %756 = vmatpush.msrb.mxu0 %v1706_v1 }
  0xbc   :  { %v378_v22 = vsub.f32 %v323_v10, %v1615_v16  ;;  %v292_v23 = vadd.f32 %v291_v15, %v255_v17  ;;  %491 = vmatmul.f32.vlgmr.msra.gmra.mxu3 %v1615_v16  ;;  %v827_v10 = vsub.f32 %v1692_v55, %v826_v61  ;;  %v1716_v15 = vsub.f32 %v726_v59, %v1706_v1  ;;  %v724_v17 = vld [vmem:[#allocation8 + $0x28] sm:$0xff] }
  0xbd   :  { %953 = vmatpush.msra.mxu3 %v1619_v31  ;;  %823 = vmatpush.msrb.mxu1 %v822_v3  ;;  %v1727_v24 = vand.u32 4294901760, %v724_v17  ;;  %v873_v3 = vsub.f32 %v720_v28, %v1776_v43 }
  0xbe   :  { %v379_v46 = vand.u32 4294901760, %v378_v22  ;;  %v321_v47 = vadd.f32 %v320_v5, %v292_v23  ;;  %549 = vmatmul.f32.vlgmr.msra.gmra.mxu0 %v378_v22  ;;  %v828_v5 = vand.u32 4294901760, %v827_v10  ;;  %v838_v23 = vand.u32 4294901760, %v1716_v15 }
  0xbf   :  { %955 = vmatpush.msra.mxu3 %v1621_v35 }
  0xc0   :  { %v380_v63 = vsub.f32 %v378_v22, %v379_v46  ;;  %v324_v6 = vmax.f32 %v321_v47, 0.0  ;;  %593 = vmatmul.f32.vlgmr.msra.gmra.mxu1 %v379_v46  ;;  %v833_v22 = vsub.f32 %v1704_v0, %v832_v11  ;;  %v839_v44 = vsub.f32 %v1716_v15, %v838_v23 }
  0xc1   :  { %957 = vmatpush.msra.mxu3 %v1623_v38  ;;  %829 = vmatpush.msrb.mxu1 %v828_v5  ;;  %v1739_v46 = vsub.f32 %v724_v17, %v1727_v24  ;;  %v1741_v47 = vand.u32 4294901760, %v723_v30 }
  0xc2   :  { %v385_v19 = vand.u32 4294901760, %v324_v6  ;;  %v381_v21 = vand.u32 4294901760, %v380_v63  ;;  %v834_v41 = vand.u32 4294901760, %v833_v22  ;;  %v874_v22 = vand.u32 4294901760, %v873_v3 }
  0xc3   :  { %959 = vmatpush.msra.mxu3 %v1625_v49  ;;  %v1748_v18 = vsub.f32 %v723_v30, %v1741_v47 }
  0xc4   :  { %v386_v34 = vsub.f32 %v324_v6, %v385_v19  ;;  %382 = vmatmul.f32.vlgmr.msra.gmra.mxu2 %v381_v21  ;;  %495 = vmatmul.f32.gmra.mxu3 %v385_v19  ;;  %v722_v6 = vld [vmem:[#allocation8 + $0x18] sm:$0xff]  ;;  %v850_v21 = vand.u32 4294901760, %v1739_v46 }
  0xc5   :  { %895 = vmatpush.msra.mxu2 %v1630_v57  ;;  %961 = vmatpush.msra.mxu3 %v1627_v54  ;;  %v1750_v27 = vand.u32 4294901760, %v722_v6  ;;  %v856_v37 = vand.u32 4294901760, %v1748_v18 }
  0xc6   :  { %554 = vmatmul.f32.gmra.mxu0 %v386_v34  ;;  %v387_v20 = vand.u32 4294901760, %v386_v34  ;;  %835 = vmatpush.msrb.mxu1 %v834_v41  ;;  %v851_v36 = vsub.f32 %v1739_v46, %v850_v21 }
  0xc7   :  { %898 = vmatpush.msra.mxu2 %v1633_v58  ;;  %963 = vmatpush.msra.mxu3 %v1681_v45  ;;  %v1763_v39 = vsub.f32 %v722_v6, %v1750_v27  ;;  %v857_v26 = vsub.f32 %v1748_v18, %v856_v37 }
  0xc8   :  { %599 = vmatmul.f32.gmra.mxu1 %v387_v20  ;;  %v388_v40 = vsub.f32 %v386_v34, %v387_v20  ;;  %v721_v34 = vld [vmem:[#allocation8 + $0x10] sm:$0xff] }
  0xc9   :  { %901 = vmatpush.msra.mxu2 %v1636_v62  ;;  %965 = vmatpush.msra.mxu3 %v1686_v51  ;;  %v1765_v20 = vand.u32 4294901760, %v721_v34  ;;  %v858_v52 = vand.u32 4294901760, %v857_v26 }
  0xca   :  { %v389_v32 = vand.u32 4294901760, %v388_v40  ;;  %v852_v40 = vand.u32 4294901760, %v851_v36 }
  0xcb   :  { %904 = vmatpush.msra.mxu2 %v1641_v7  ;;  %967 = vmatpush.msra.mxu3 %v1694_v56  ;;  %v867_v42 = vsub.f32 %v721_v34, %v1765_v20 }
  0xcc   :  { %390 = vmatmul.f32.gmra.mxu2 %v389_v32  ;;  %709 = vmatmul.f32.vlgmr.msrb.gmra.mxu3 %v1615_v16  ;;  %v862_v32 = vand.u32 4294901760, %v1763_v39 }
  0xcd   :  { %907 = vmatpush.msra.mxu2 %v1644_v8  ;;  %969 = vmatpush.msra.mxu3 %v1706_v1  ;;  %v868_v60 = vand.u32 4294901760, %v867_v42 }
  0xce   :  { %v863_v59 = vsub.f32 %v1763_v39, %v862_v32 }
  0xcf   :  { %910 = vmatpush.msra.mxu2 %v1684_v50  ;;  %v869_v17 = vsub.f32 %v867_v42, %v868_v60 }
  0xd0   :  { %v864_v10 = vand.u32 4294901760, %v863_v59 }
  0xd1   :  { %913 = vmatpush.msra.mxu2 %v1692_v55  ;;  %v870_v30 = vand.u32 4294901760, %v869_v17 }
  0xd3   :  { %916 = vmatpush.msra.mxu2 %v1704_v0 }
  0xd4   :  { %668 = vmatmul.f32.vlgmr.msrb.gmra.mxu2 %v1615_v16  ;;  %713 = vmatmul.f32.gmra.mxu3 %v385_v19  ;;  %v1720_v16 = vand.u32 4294901760, %v725_v2 }
  0xd5   :  { %919 = vmatpush.msra.mxu2 %v1716_v15 }
  0xd6   :  { %v1731_v25 = vsub.f32 %v725_v2, %v1720_v16  ;;  %758 = vmatpush.msrb.mxu0 %v1720_v16  ;;  %971 = vmatpush.msra.mxu3 %v1720_v16  ;;  %v1780_v2 = vand.u32 4294901760, %v719_v48 }
  0xd8   :  { %v844_v63 = vand.u32 4294901760, %v1731_v25  ;;  %760 = vmatpush.msrb.mxu0 %v1727_v24  ;;  %922 = vmatpush.msra.mxu2 %v1731_v25  ;;  %v879_v5 = vsub.f32 %v719_v48, %v1780_v2 }
  0xd9   :  { %973 = vmatpush.msra.mxu3 %v1727_v24 }
  0xda   :  { %v845_v29 = vsub.f32 %v1731_v25, %v844_v63  ;;  %762 = vmatpush.msrb.mxu0 %v1741_v47  ;;  %925 = vmatpush.msra.mxu2 %v1739_v46  ;;  %v880_v41 = vand.u32 4294901760, %v879_v5 }
  0xdb   :  { %975 = vmatpush.msra.mxu3 %v1741_v47 }
  0xdc   :  { %672 = vmatmul.f32.gmra.mxu2 %v385_v19  ;;  %v840_v19 = vand.u32 4294901760, %v839_v44  ;;  %v846_v13 = vand.u32 4294901760, %v845_v29  ;;  %764 = vmatpush.msrb.mxu0 %v1750_v27  ;;  %v875_v44 = vsub.f32 %v873_v3, %v874_v22  ;;  %v881_v6 = vsub.f32 %v879_v5, %v880_v41 }
  0xdd   :  { %928 = vmatpush.msra.mxu2 %v1748_v18  ;;  %977 = vmatpush.msra.mxu3 %v1750_v27 }
  0xde   :  { %841 = vmatpush.msrb.mxu1 %v840_v19  ;;  %766 = vmatpush.msrb.mxu0 %v1765_v20  ;;  %v876_v19 = vand.u32 4294901760, %v875_v44  ;;  %v882_v29 = vand.u32 4294901760, %v881_v6 }
  0xdf   :  { %931 = vmatpush.msra.mxu2 %v1763_v39  ;;  %979 = vmatpush.msra.mxu3 %v1765_v20 }
  0xe0   :  { %847 = vmatpush.msrb.mxu1 %v846_v13  ;;  %768 = vmatpush.msrb.mxu0 %v1776_v43 }
  0xe1   :  { %934 = vmatpush.msra.mxu2 %v867_v42  ;;  %981 = vmatpush.msra.mxu3 %v1776_v43 }
  0xe2   :  { %853 = vmatpush.msrb.mxu1 %v852_v40  ;;  %770 = vmatpush.msrb.mxu0 %v1780_v2 }
  0xe3   :  { %937 = vmatpush.msra.mxu2 %v873_v3  ;;  %983 = vmatpush.msra.mxu3 %v1780_v2 }
  0xe4   :  { %859 = vmatpush.msrb.mxu1 %v858_v52  ;;  %1000 = vmatpush.msra.mxu0 %v790_v4 }
  0xe5   :  { %940 = vmatpush.msra.mxu2 %v879_v5 }
  0xe6   :  { %865 = vmatpush.msrb.mxu1 %v864_v10  ;;  %1004 = vmatpush.msra.mxu0 %v796_v12 }
  0xe8   :  { %871 = vmatpush.msrb.mxu1 %v870_v30  ;;  %1008 = vmatpush.msra.mxu0 %v802_v14 }
  0xea   :  { %877 = vmatpush.msrb.mxu1 %v876_v19  ;;  %1012 = vmatpush.msra.mxu0 %v808_v9 }
  0xec   :  { %883 = vmatpush.msrb.mxu1 %v882_v29  ;;  %1016 = vmatpush.msra.mxu0 %v814_v33 }
  0xee   :  { %1071 = vmatpush.msra.mxu1 %v1619_v31  ;;  %1020 = vmatpush.msra.mxu0 %v820_v53 }
  0xf0   :  { %1073 = vmatpush.msra.mxu1 %v1621_v35  ;;  %1024 = vmatpush.msra.mxu0 %v826_v61  ;;  %v1150_v35 = vld [vmem:[%s1846_s4] ss:$0 sm:$0xff] }
  0xf2   :  { %1075 = vmatpush.msra.mxu1 %v1623_v38  ;;  %1028 = vmatpush.msra.mxu0 %v832_v11 }
  0xf4   :  { %1077 = vmatpush.msra.mxu1 %v1625_v49  ;;  %1032 = vmatpush.msra.mxu0 %v838_v23 }
  0xf6   :  { %1079 = vmatpush.msra.mxu1 %v1627_v54  ;;  %1036 = vmatpush.msra.mxu0 %v844_v63 }
  0xf8   :  { %1081 = vmatpush.msra.mxu1 %v1681_v45  ;;  %1040 = vmatpush.msra.mxu0 %v850_v21 }
  0xfa   :  { %1083 = vmatpush.msra.mxu1 %v1686_v51  ;;  %1044 = vmatpush.msra.mxu0 %v856_v37  ;;  %v1151_v37 = vld [vmem:[%s1848_s6] ss:$0 sm:$0xff]  ;;  %s1286_s6 = smov [#allocation10]  }
  0xfb   :  { %s1117_s23 = sshll.u32 %s1286_s6, 4  ;;  %s1118_s23 = int_to_ptr.vmem [resolvable:$true] %s1117_s23 }
  0xfc   :  { %1085 = vmatpush.msra.mxu1 %v1694_v56  ;;  %1048 = vmatpush.msra.mxu0 %v862_v32 }
  0xfe   :  { %1087 = vmatpush.msra.mxu1 %v1706_v1  ;;  %1052 = vmatpush.msra.mxu0 %v868_v60 }
 0x100   :  { %1089 = vmatpush.msra.mxu1 %v1720_v16  ;;  %1056 = vmatpush.msra.mxu0 %v874_v22 }
 0x102   :  { %1091 = vmatpush.msra.mxu1 %v1727_v24  ;;  %1060 = vmatpush.msra.mxu0 %v880_v41 }
 0x104   :  { %1093 = vmatpush.msra.mxu1 %v1741_v47 }
 0x106   :  { %1095 = vmatpush.msra.mxu1 %v1750_v27 }
 0x108   :  { %1097 = vmatpush.msra.mxu1 %v1765_v20 }
 0x10a   :  { %1099 = vmatpush.msra.mxu1 %v1776_v43 }
 0x10c   :  { %1101 = vmatpush.msra.mxu1 %v1780_v2 }
 0x13b   :  { %v550_v58 = vpop.f32.mrf.mxu0 }
 0x13d   :  { %v594_v4 = vpop.f32.mrf.mxu1 }
 0x13f   :  { %v492_v31 = vpop.f32.mrf.mxu3 }
 0x143   :  { %v555_v50 = vpop.f32.mrf.mxu0 }
 0x145   :  { %v600_v56 = vpop.f32.mrf.mxu1 }
 0x147   :  { %v383_v38 = vpop.f32.mrf.mxu2  ;;  %v496_v54 = vpop.f32.mrf.mxu3 }
 0x148   :  { %v384_v49 = vadd.f32 %v1150_v35, %v383_v38 }
 0x14a   :  { %v493_v57 = vadd.f32 %v492_v31, %v384_v49 }
 0x14c   :  { %v551_v8 = vadd.f32 %v550_v58, %v493_v57 }
 0x14e   :  { %v595_v14 = vadd.f32 %v594_v4, %v551_v8 }
 0x14f   :  { %v391_v62 = vpop.f32.mrf.mxu2  ;;  %v710_v9 = vpop.f32.mrf.mxu3 }
 0x150   :  { %v392_v7 = vadd.f32 %v1150_v35, %v391_v62 }
 0x152   :  { %v497_v12 = vadd.f32 %v496_v54, %v392_v7 }
 0x154   :  { %v556_v53 = vadd.f32 %v555_v50, %v497_v12 }
 0x156   :  { %v601_v0 = vadd.f32 %v600_v56, %v556_v53 }
 0x157   :  { %v669_v33 = vpop.f32.mrf.mxu2  ;;  %v714_v16 = vpop.f32.mrf.mxu3 }
 0x158   :  { %v670_v45 = vadd.f32 %v669_v33, %v595_v14 }
 0x15a   :  { %v711_v51 = vadd.f32 %v710_v9, %v670_v45 }
 0x15c   :  { %v717_v55 = vmax.f32 %v711_v51, 0.0 }
 0x15e   :  { %v771_v61 = vand.u32 4294901760, %v717_v55 }
 0x15f   :  { %v673_v1 = vpop.f32.mrf.mxu2 }
 0x160   :  { %v772_v11 = vsub.f32 %v717_v55, %v771_v61  ;;  %v674_v15 = vadd.f32 %v673_v1, %v601_v0  ;;  %885 = vmatmul.f32.vlgmr.msrb.gmra.mxu1 %v771_v61 }
 0x162   :  { %v715_v23 = vadd.f32 %v714_v16, %v674_v15  ;;  %943 = vmatmul.f32.vlgmr.msra.gmra.mxu2 %v772_v11  ;;  %v773_v24 = vand.u32 4294901760, %v772_v11 }
 0x164   :  { %v718_v25 = vmax.f32 %v715_v23, 0.0  ;;  %987 = vmatmul.f32.vlgmr.msra.gmra.mxu3 %v773_v24  ;;  %v774_v46 = vsub.f32 %v772_v11, %v773_v24 }
 0x166   :  { %v779_v47 = vand.u32 4294901760, %v718_v25  ;;  %v775_v63 = vand.u32 4294901760, %v774_v46 }
 0x168   :  { %776 = vmatmul.f32.vlgmr.msrb.gmra.mxu0 %v775_v63  ;;  %889 = vmatmul.f32.gmra.mxu1 %v779_v47  ;;  %v780_v21 = vsub.f32 %v718_v25, %v779_v47 }
 0x16a   :  { %948 = vmatmul.f32.gmra.mxu2 %v780_v21  ;;  %v781_v18 = vand.u32 4294901760, %v780_v21 }
 0x16c   :  { %993 = vmatmul.f32.gmra.mxu3 %v781_v18  ;;  %v782_v27 = vsub.f32 %v780_v21, %v781_v18 }
 0x16e   :  { %v783_v34 = vand.u32 4294901760, %v782_v27 }
 0x170   :  { %784 = vmatmul.f32.gmra.mxu0 %v783_v34  ;;  %1103 = vmatmul.f32.vlgmr.msra.gmra.mxu1 %v771_v61 }
 0x178   :  { %1062 = vmatmul.f32.vlgmr.msra.gmra.mxu0 %v771_v61  ;;  %1107 = vmatmul.f32.gmra.mxu1 %v779_v47 }
 0x180   :  { %1066 = vmatmul.f32.gmra.mxu0 %v779_v47 }
 0x1dd   :  { %v886_v36 = vpop.f32.mrf.mxu1 }
 0x1e5   :  { %v777_v39 = vpop.f32.mrf.mxu0  ;;  %v890_v13 = vpop.f32.mrf.mxu1 }
 0x1e6   :  { %v778_v20 = vadd.f32 %v1151_v37, %v777_v39  ;;  %v944_v40 = vpop.f32.mrf.mxu2 }
 0x1e7   :  { %v988_v43 = vpop.f32.mrf.mxu3 }
 0x1e8   :  { %v887_v28 = vadd.f32 %v886_v36, %v778_v20 }
 0x1ea   :  { %v945_v32 = vadd.f32 %v944_v40, %v887_v28 }
 0x1ec   :  { %v989_v48 = vadd.f32 %v988_v43, %v945_v32 }
 0x1ed   :  { %v785_v26 = vpop.f32.mrf.mxu0  ;;  %v1104_v59 = vpop.f32.mrf.mxu1 }
 0x1ee   :  { %v786_v42 = vadd.f32 %v1151_v37, %v785_v26  ;;  %v949_v3 = vpop.f32.mrf.mxu2 }
 0x1ef   :  { %v994_v5 = vpop.f32.mrf.mxu3 }
 0x1f0   :  { %v891_v52 = vadd.f32 %v890_v13, %v786_v42 }
 0x1f2   :  { %v950_v10 = vadd.f32 %v949_v3, %v891_v52 }
 0x1f4   :  { %v995_v22 = vadd.f32 %v994_v5, %v950_v10 }
 0x1f5   :  { %v1063_v60 = vpop.f32.mrf.mxu0  ;;  %v1108_v44 = vpop.f32.mrf.mxu1 }
 0x1f6   :  { %v1064_v2 = vadd.f32 %v1063_v60, %v989_v48 }
 0x1f8   :  { %v1105_v17 = vadd.f32 %v1104_v59, %v1064_v2 }
 0x1fa   :  { %1111 = vst [vmem:[#allocation10] sm:$0xff] %v1105_v17 }
 0x1fd   :  { %v1067_v30 = vpop.f32.mrf.mxu0 }
 0x1fe   :  { %v1068_v41 = vadd.f32 %v1067_v30, %v995_v22 }
 0x200   :  { %v1109_v6 = vadd.f32 %v1108_v44, %v1068_v41 }
 0x202   :  { %1112 = vst [vmem:[#allocation10 + $0x8] sm:$0xff] %v1109_v6 }
 0x203   :  { %1125 = dma.vmem_to_hbm [thread:$0]  %s1118_s23, 256, %s1120_s26, [#allocation4], %s1281_s9, %s1281_s9, %s1282_s10  }
 0x204   :  { %1278 = dma.done.wait [#allocation4], 256  }
 0x205   :  { %1279 = vsyncadd [#allocation4], 4294967040 }
 0x206   :  { %1130 = vsyncpa [#allocation3], 1 }
 0x207   :  { %1131 = vsyncpa [#allocation6], 1 }
 0x208   :  { %1132 = vsyncpa [#allocation9], 1 }
 0x209   :  { %1133 = vsyncpa [#allocation4], 1 }

</bundles_post_ra>
